<compile_context>
chip_gen: v5e
topology: v5e:2x2
jax: 0.10.0
libtpu: 0.0.40
codegen_flags: <defaults>
</compile_context>

<pallas_src>
import math

import jax
import jax.numpy as jnp
from jax.experimental import pallas as pl
from jax.experimental.pallas import tpu as pltpu  # noqa: F401  (TPU backend)

# ----------------------------- config (small) -----------------------------
BATCH = 2
SEQ = 8
VOCAB = 32
HIDDEN = 32
NUM_HEADS = 2
HEAD_DIM = HIDDEN // NUM_HEADS
NUM_LAYERS = 2
INTERMEDIATE = 64
MAX_POS = 16
TYPE_VOCAB = 2
NUM_LABELS = 2
LN_EPS = 1e-12  # BERT default

BS = BATCH * SEQ
EMB_ROWS = VOCAB + MAX_POS + TYPE_VOCAB  # 50 rows in the packed embedding table


# --------------------- shared math helpers (values only) -------------------

def _layernorm(x, g, b, eps=LN_EPS):
    mu = jnp.mean(x, axis=-1, keepdims=True)
    var = jnp.mean((x - mu) * (x - mu), axis=-1, keepdims=True)
    return (x - mu) * jax.lax.rsqrt(var + eps) * g + b


def _gelu_tanh(x):
    # TODO(synk): HF BERT default is the exact erf GELU; tanh approximation used here.
    return 0.5 * x * (1.0 + jnp.tanh(0.7978845608028654 * (x + 0.044715 * x * x * x)))


# ----------------------------- fused Pallas kernel --------------------------

def _bert_forward_kernel(ids_ref, mask_ref, w_ref, v_ref, h_ref, out_ref):
    """Whole BERT-classifier forward: token ids -> [B, num_labels] log-probs.

    Operands (5 DMAs total):
      ids_ref : [B*S, 3] int32   (word id, position id, token-type id)
      mask_ref: [B*S, B*S] f32   additive bias (0 / -1e9), cross-batch + padding
      w_ref   : [L+1, 4, 64, 96] bf16 packed matrices
                 [l,0,:H,:3H]=qkv_w  [l,1,:H,:H]=o_w  [l,2,:H,:I]=i_w  [l,3,:I,:H]=f_w
                 [L,0,:H,:H]=pool_w  [L,0,:H,H:H+NL]=clf_w
      v_ref   : [L, 8, 96] f32 packed vectors
                 rows: qkv_b, o_b, ln1_g, ln1_b, i_b, f_b, ln2_g, ln2_b
      h_ref   : [50+4, 32] f32: word/pos/type embedding table, then
                 emb_ln_g, emb_ln_b, pool_b, clf_b
    """
    f32, bf16 = jnp.float32, jnp.bfloat16
    h, dh, nh = HIDDEN, HEAD_DIM, NUM_HEADS
    scale = 1.0 / math.sqrt(dh)

    ids = ids_ref[...]                    # [BS, 3] int32
    mask = mask_ref[...]                  # [BS, BS] f32, fully hoisted
    hslab = h_ref[...]                    # [54, 32] f32
    table = hslab[0:EMB_ROWS, :]          # [50, 32]
    emb_ln_g = hslab[EMB_ROWS + 0:EMB_ROWS + 1, :]
    emb_ln_b = hslab[EMB_ROWS + 1:EMB_ROWS + 2, :]
    pool_b = hslab[EMB_ROWS + 2:EMB_ROWS + 3, :]
    clf_b = hslab[EMB_ROWS + 3:EMB_ROWS + 4, 0:NUM_LABELS]

    # ---- embedding lookup as one MXU matmul (one-hot gather, no XLA gather op) ----
    col = jax.lax.broadcasted_iota(jnp.int32, (BS, EMB_ROWS), 1)
    onehot = ((col == ids[:, 0:1]).astype(f32)
              + (col == ids[:, 1:2] + VOCAB).astype(f32)
              + (col == ids[:, 2:3] + VOCAB + MAX_POS).astype(f32))
    emb = jnp.dot(onehot, table, preferred_element_type=f32)          # [BS, H]

    x = _layernorm(emb, emb_ln_g, emb_ln_b)

    # Static Python layer loop: fine at L=2.
    # TODO(synk): at real depths use lax.fori_loop / a grid axis with streamed
    # per-layer weight blocks to bound vreg/VMEM pressure.
    for l in range(NUM_LAYERS):
        wl = w_ref[l]                     # [4, 64, 96] bf16
        vl = v_ref[l]                     # [8, 96] f32
        qkv_w = wl[0, 0:h, 0:3 * h]
        o_w = wl[1, 0:h, 0:h]
        i_w = wl[2, 0:h, 0:INTERMEDIATE]
        f_w = wl[3, 0:INTERMEDIATE, 0:h]
        qkv_b = vl[0:1, 0:3 * h]
        o_b = vl[1:2, 0:h]
        ln1_g = vl[2:3, 0:h]
        ln1_b = vl[3:4, 0:h]
        i_b = vl[4:5, 0:INTERMEDIATE]
        f_b = vl[5:6, 0:h]
        ln2_g = vl[6:7, 0:h]
        ln2_b = vl[7:8, 0:h]

        # ---- self-attention: fused QKV projection (bf16 MXU, f32 accumulate) ----
        qkv = jnp.dot(x.astype(bf16), qkv_w, preferred_element_type=f32) + qkv_b

        # Joint-batch attention: scores over all B*S rows at once per head; the
        # hoisted mask blocks cross-batch and padded keys. merge_heads folded
        # into the output projection via per-head accumulation (no concats).
        attn = jnp.zeros((BS, h), f32)
        for hh in range(nh):
            c = hh * dh
            qh = qkv[:, c:c + dh]
            kh = qkv[:, h + c:h + c + dh]
            vh = qkv[:, 2 * h + c:2 * h + c + dh]
            s = jax.lax.dot_general(
                qh.astype(bf16), kh.astype(bf16),
                dimension_numbers=(((1,), (1,)), ((), ())),
                preferred_element_type=f32) * scale + mask            # [BS, BS]
            m = jnp.max(s, axis=-1, keepdims=True)
            e = jnp.exp(s - m)
            p = e * pl.reciprocal(jnp.sum(e, axis=-1, keepdims=True), approx=True)
            ctx = jnp.dot(p.astype(bf16), vh.astype(bf16),
                          preferred_element_type=f32)                 # [BS, dh]
            attn = attn + jnp.dot(ctx.astype(bf16), o_w[c:c + dh, :],
                                  preferred_element_type=f32)
        attn = attn + o_b
        x = _layernorm(attn + x, ln1_g, ln1_b)

        # ---- feed-forward (bf16 MXU, f32 elementwise) ----
        inter = _gelu_tanh(
            jnp.dot(x.astype(bf16), i_w, preferred_element_type=f32) + i_b)
        ffn = jnp.dot(inter.astype(bf16), f_w, preferred_element_type=f32) + f_b
        x = _layernorm(ffn + x, ln2_g, ln2_b)

    # ---- pooler (CLS via 0/1 selection matmul) + classifier + log_softmax ----
    sel_col = jax.lax.broadcasted_iota(jnp.int32, (BATCH, BS), 1)
    sel_row = jax.lax.broadcasted_iota(jnp.int32, (BATCH, BS), 0)
    sel = (sel_col == SEQ * sel_row).astype(f32)                      # [B, BS]
    cls = jnp.dot(sel, x, preferred_element_type=f32)                 # [B, H]

    wh = w_ref[NUM_LAYERS]                                            # head pseudo-layer
    pool_w = wh[0, 0:h, 0:h]
    clf_w = wh[0, 0:h, h:h + NUM_LABELS]
    pooled = jnp.tanh(
        jnp.dot(cls.astype(bf16), pool_w, preferred_element_type=f32) + pool_b)
    logits = (jnp.dot(pooled.astype(bf16), clf_w, preferred_element_type=f32) + clf_b)
    mlog = jnp.max(logits, axis=-1, keepdims=True)
    sh = logits - mlog
    out_ref[...] = sh - jnp.log(jnp.sum(jnp.exp(sh), axis=-1, keepdims=True))


def _cost_estimate():
    per_layer = (2 * BS * HIDDEN * 3 * HIDDEN                                 # fused QKV
                 + NUM_HEADS * (2 * BS * BS * HEAD_DIM * 2                    # scores+ctx
                                + 2 * BS * HEAD_DIM * HIDDEN)                 # per-head o_w
                 + 2 * BS * HIDDEN * INTERMEDIATE * 2)                        # FFN up+down
    flops = (NUM_LAYERS * per_layer
             + 2 * BS * EMB_ROWS * HIDDEN                                     # one-hot embed
             + 2 * BATCH * BS * HIDDEN                                        # CLS select
             + 2 * BATCH * HIDDEN * (HIDDEN + NUM_LABELS))                    # pool + clf
    transcendentals = (NUM_LAYERS * (NUM_HEADS * BS * (BS + 1) + BS * INTERMEDIATE)
                       + BATCH * HIDDEN + BATCH * NUM_LABELS)
    bytes_accessed = (2 * (NUM_LAYERS + 1) * 4 * 64 * 96                      # bf16 W slab
                      + 4 * NUM_LAYERS * 8 * 96                               # f32 V slab
                      + 4 * (EMB_ROWS + 4) * HIDDEN                           # f32 H slab
                      + 4 * BS * 3 + 4 * BS * BS                              # ids + mask
                      + 4 * BATCH * NUM_LABELS)
    return pl.CostEstimate(flops=int(flops), transcendentals=int(transcendentals),
                           bytes_accessed=int(bytes_accessed))


# ----------------------------- parameter init & packing -----------------------------

def init_params(key):
    keys = iter(jax.random.split(key, 16))

    def w(*shape):
        return jax.random.normal(next(keys), shape, jnp.float32) * 0.02

    L, H, I = NUM_LAYERS, HIDDEN, INTERMEDIATE
    return {
        "word_emb": w(VOCAB, H),
        "pos_emb": w(MAX_POS, H),
        "type_emb": w(TYPE_VOCAB, H),
        "emb_ln_g": jnp.ones((1, H), jnp.float32),
        "emb_ln_b": jnp.zeros((1, H), jnp.float32),
        "qkv_w": w(L, H, 3 * H), "qkv_b": jnp.zeros((L, 1, 3 * H), jnp.float32),
        "o_w": w(L, H, H),       "o_b": jnp.zeros((L, 1, H), jnp.float32),
        "ln1_g": jnp.ones((L, 1, H), jnp.float32),
        "ln1_b": jnp.zeros((L, 1, H), jnp.float32),
        "i_w": w(L, H, I),       "i_b": jnp.zeros((L, 1, I), jnp.float32),
        "f_w": w(L, I, H),       "f_b": jnp.zeros((L, 1, H), jnp.float32),
        "ln2_g": jnp.ones((L, 1, H), jnp.float32),
        "ln2_b": jnp.zeros((L, 1, H), jnp.float32),
        "pool_w": w(H, H), "pool_b": jnp.zeros((1, H), jnp.float32),
        "clf_w": w(H, NUM_LABELS), "clf_b": jnp.zeros((1, NUM_LABELS), jnp.float32),
    }


def pack_params(p):
    """Pack all parameters into 3 slabs (done once, outside the jitted forward)."""
    L, H, I = NUM_LAYERS, HIDDEN, INTERMEDIATE

    wslab = jnp.zeros((L + 1, 4, 64, 96), jnp.float32)
    for l in range(L):
        wslab = wslab.at[l, 0, 0:H, 0:3 * H].set(p["qkv_w"][l])
        wslab = wslab.at[l, 1, 0:H, 0:H].set(p["o_w"][l])
        wslab = wslab.at[l, 2, 0:H, 0:I].set(p["i_w"][l])
        wslab = wslab.at[l, 3, 0:I, 0:H].set(p["f_w"][l])
    wslab = wslab.at[L, 0, 0:H, 0:H].set(p["pool_w"])
    wslab = wslab.at[L, 0, 0:H, H:H + NUM_LABELS].set(p["clf_w"])
    wslab = wslab.astype(jnp.bfloat16)            # bf16 MXU inputs, half the DMA bytes

    vslab = jnp.zeros((L, 8, 96), jnp.float32)
    for l in range(L):
        vslab = vslab.at[l, 0, 0:3 * H].set(p["qkv_b"][l, 0])
        vslab = vslab.at[l, 1, 0:H].set(p["o_b"][l, 0])
        vslab = vslab.at[l, 2, 0:H].set(p["ln1_g"][l, 0])
        vslab = vslab.at[l, 3, 0:H].set(p["ln1_b"][l, 0])
        vslab = vslab.at[l, 4, 0:I].set(p["i_b"][l, 0])
        vslab = vslab.at[l, 5, 0:H].set(p["f_b"][l, 0])
        vslab = vslab.at[l, 6, 0:H].set(p["ln2_g"][l, 0])
        vslab = vslab.at[l, 7, 0:H].set(p["ln2_b"][l, 0])

    hslab = jnp.zeros((EMB_ROWS + 4, H), jnp.float32)
    hslab = hslab.at[0:VOCAB].set(p["word_emb"])
    hslab = hslab.at[VOCAB:VOCAB + MAX_POS].set(p["pos_emb"])
    hslab = hslab.at[VOCAB + MAX_POS:EMB_ROWS].set(p["type_emb"])
    hslab = hslab.at[EMB_ROWS + 0].set(p["emb_ln_g"][0])
    hslab = hslab.at[EMB_ROWS + 1].set(p["emb_ln_b"][0])
    hslab = hslab.at[EMB_ROWS + 2].set(p["pool_b"][0])
    hslab = hslab.at[EMB_ROWS + 3, 0:NUM_LABELS].set(p["clf_b"][0])

    return {"w": wslab, "v": vslab, "h": hslab}


# ----------------------------- forward pass -----------------------------

def bert_zeroshot_clf_qa_forward(packed, input_ids, attention_mask, token_type_ids):
    """Equivalent of BERTZeroShotClfQA.forward: log_softmax(BERT(...).logits)."""
    # TODO(synk): tokenizer / string normalization of the PyTorch module have no
    # numeric equivalent; we start from already-tokenized integer ids.
    b, s = input_ids.shape
    pos = jnp.tile(jnp.arange(s, dtype=jnp.int32), (b,))
    ids = jnp.stack([input_ids.reshape(-1).astype(jnp.int32), pos,
                     token_type_ids.reshape(-1).astype(jnp.int32)], axis=-1)  # [B*S, 3]

    # Hoisted additive mask over the joint B*S key axis: blocks cross-batch
    # attention and padded keys in one matrix, built once.
    batch_id = jnp.repeat(jnp.arange(b, dtype=jnp.int32), s)
    same = batch_id[:, None] == batch_id[None, :]
    key_ok = (attention_mask.reshape(-1) == 1)[None, :]
    mask_full = jnp.where(same & key_ok, 0.0, -1e9).astype(jnp.float32)       # [B*S, B*S]

    return pl.pallas_call(
        _bert_forward_kernel,
        out_shape=jax.ShapeDtypeStruct((b, NUM_LABELS), jnp.float32),
        cost_estimate=_cost_estimate(),
    )(ids, mask_full, packed["w"], packed["v"], packed["h"])


# ------------------------- pure-JAX reference (check) ------------------------
# Mirrors the kernel's numerics (bf16 MXU inputs, f32 accumulation / elementwise)
# so the comparison isolates kernel-lowering differences.

def _reference_forward(params, input_ids, attention_mask, token_type_ids):
    f32, bf16 = jnp.float32, jnp.bfloat16

    def mm(a, b):
        return jnp.dot(a.astype(bf16), b.astype(bf16), preferred_element_type=f32)

    b, s = input_ids.shape
    emb = (params["word_emb"][input_ids]
           + params["pos_emb"][jnp.arange(s)][None, :, :]
           + params["type_emb"][token_type_ids]).astype(f32).reshape(b * s, HIDDEN)
    x = _layernorm(emb, params["emb_ln_g"], params["emb_ln_b"])
    mask_bias = (1.0 - attention_mask.astype(f32)) * -1e9                     # [B, S]
    scale = 1.0 / math.sqrt(HEAD_DIM)

    for l in range(NUM_LAYERS):
        qkv = mm(x, params["qkv_w"][l]) + params["qkv_b"][l]
        q, k, v = (qkv[:, :HIDDEN], qkv[:, HIDDEN:2 * HIDDEN], qkv[:, 2 * HIDDEN:])

        def split(t):
            return t.reshape(BATCH, SEQ, NUM_HEADS, HEAD_DIM).transpose(0, 2, 1, 3)

        qh, kh, vh = split(q), split(k), split(v)
        sc = jnp.einsum("bhqd,bhkd->bhqk", qh.astype(bf16), kh.astype(bf16),
                        preferred_element_type=f32) * scale
        sc = sc + mask_bias[:, None, None, :]
        p = jax.nn.softmax(sc, axis=-1)
        ctx = jnp.einsum("bhqk,bhkd->bhqd", p.astype(bf16), vh.astype(bf16),
                         preferred_element_type=f32)
        ctx = ctx.transpose(0, 2, 1, 3).reshape(BATCH * SEQ, HIDDEN)
        attn_out = mm(ctx, params["o_w"][l]) + params["o_b"][l]
        x = _layernorm(attn_out + x, params["ln1_g"][l], params["ln1_b"][l])
        inter = _gelu_tanh(mm(x, params["i_w"][l]) + params["i_b"][l])
        ffn = mm(inter, params["f_w"][l]) + params["f_b"][l]
        x = _layernorm(ffn + x, params["ln2_g"][l], params["ln2_b"][l])

    cls = x.reshape(BATCH, SEQ, HIDDEN)[:, 0, :]
    pooled = jnp.tanh(mm(cls, params["pool_w"]) + params["pool_b"])
    logits = mm(pooled, params["clf_w"]) + params["clf_b"]
    return jax.nn.log_softmax(logits, axis=-1)


# ----------------------------- main -----------------------------

if __name__ == "__main__":
    key = jax.random.PRNGKey(0)
    pkey, dkey = jax.random.split(key)
    params = init_params(pkey)
    packed = pack_params(params)   # packed once (3 slab DMAs + ids + mask at run time)

    input_ids = jax.random.randint(dkey, (BATCH, SEQ), 0, VOCAB, dtype=jnp.int32)
    # second example has 2 padding positions at the end
    attention_mask = jnp.array([[1] * SEQ, [1] * (SEQ - 2) + [0] * 2], dtype=jnp.int32)
    token_type_ids = jnp.zeros((BATCH, SEQ), dtype=jnp.int32)

    fwd = jax.jit(bert_zeroshot_clf_qa_forward)
    out = jax.block_until_ready(fwd(packed, input_ids, attention_mask, token_type_ids))

    assert out.shape == (BATCH, NUM_LABELS)
    # log-probabilities should sum to ~1 after exp (final log_softmax is exact f32)
    assert bool(jnp.all(jnp.abs(jnp.sum(jnp.exp(out), axis=-1) - 1.0) < 1e-4))

    # cross-check against a pure-JAX reference using the same bf16-input / f32-acc
    # matmul numerics; tolerance loosened slightly for the EUP approx reciprocal
    # in the kernel softmax and per-head accumulation ordering.
    ref = _reference_forward(params, input_ids, attention_mask, token_type_ids)
    max_err = float(jnp.max(jnp.abs(out - ref)))
    assert max_err < 1e-2, f"kernel vs reference mismatch: {max_err}"

    print("KERNEL_OK")
</pallas_src>

<mosaic_0001>
module attributes {stable_mosaic.version = 11 : i64} {
  func.func @_bert_forward_kernel(%arg0: memref<16x3xi32, #tpu.memory_space<vmem>>, %arg1: memref<16x16xf32, #tpu.memory_space<vmem>>, %arg2: memref<3x4x64x96xbf16, #tpu.memory_space<vmem>>, %arg3: memref<2x8x96xf32, #tpu.memory_space<vmem>>, %arg4: memref<54x32xf32, #tpu.memory_space<vmem>>, %arg5: memref<2x2xf32, #tpu.memory_space<vmem>>) attributes {dimension_semantics = [], scalar_prefetch = 0 : i64, scratch_operands = 0 : i64, tpu.core_type = #tpu.core_type<tc>} {
    %c0 = arith.constant 0 : index
    %c0_0 = arith.constant 0 : index
    %0 = vector.load %arg0[%c0, %c0_0] : memref<16x3xi32, #tpu.memory_space<vmem>>, vector<16x3xi32>
    %c0_1 = arith.constant 0 : index
    %c0_2 = arith.constant 0 : index
    %1 = vector.load %arg1[%c0_1, %c0_2] : memref<16x16xf32, #tpu.memory_space<vmem>>, vector<16x16xf32>
    %c0_3 = arith.constant 0 : index
    %c0_4 = arith.constant 0 : index
    %2 = vector.load %arg4[%c0_3, %c0_4] : memref<54x32xf32, #tpu.memory_space<vmem>>, vector<54x32xf32>
    %3 = vector.extract_strided_slice %2 {offsets = [0, 0], sizes = [50, 32], strides = [1, 1]} : vector<54x32xf32> to vector<50x32xf32>
    %4 = vector.extract_strided_slice %2 {offsets = [50, 0], sizes = [1, 32], strides = [1, 1]} : vector<54x32xf32> to vector<1x32xf32>
    %5 = vector.extract_strided_slice %2 {offsets = [51, 0], sizes = [1, 32], strides = [1, 1]} : vector<54x32xf32> to vector<1x32xf32>
    %6 = vector.extract_strided_slice %2 {offsets = [52, 0], sizes = [1, 32], strides = [1, 1]} : vector<54x32xf32> to vector<1x32xf32>
    %7 = vector.extract_strided_slice %2 {offsets = [53, 0], sizes = [1, 2], strides = [1, 1]} : vector<54x32xf32> to vector<1x2xf32>
    %8 = tpu.iota {dimensions = array<i32: 1>} : vector<16x50xi32>
    %9 = vector.extract_strided_slice %0 {offsets = [0, 0], sizes = [16, 1], strides = [1, 1]} : vector<16x3xi32> to vector<16x1xi32>
    %10 = vector.broadcast %9 : vector<16x1xi32> to vector<16x50xi32>
    %11 = arith.cmpi eq, %8, %10 : vector<16x50xi32>
    %12 = arith.extui %11 : vector<16x50xi1> to vector<16x50xi32>
    %13 = arith.sitofp %12 : vector<16x50xi32> to vector<16x50xf32>
    %14 = vector.extract_strided_slice %0 {offsets = [0, 1], sizes = [16, 1], strides = [1, 1]} : vector<16x3xi32> to vector<16x1xi32>
    %c32_i32 = arith.constant 32 : i32
    %15 = vector.broadcast %c32_i32 : i32 to vector<16x1xi32>
    %16 = arith.addi %14, %15 : vector<16x1xi32>
    %17 = vector.broadcast %16 : vector<16x1xi32> to vector<16x50xi32>
    %18 = arith.cmpi eq, %8, %17 : vector<16x50xi32>
    %19 = arith.extui %18 : vector<16x50xi1> to vector<16x50xi32>
    %20 = arith.sitofp %19 : vector<16x50xi32> to vector<16x50xf32>
    %21 = arith.addf %13, %20 : vector<16x50xf32>
    %22 = vector.extract_strided_slice %0 {offsets = [0, 2], sizes = [16, 1], strides = [1, 1]} : vector<16x3xi32> to vector<16x1xi32>
    %c32_i32_5 = arith.constant 32 : i32
    %23 = vector.broadcast %c32_i32_5 : i32 to vector<16x1xi32>
    %24 = arith.addi %22, %23 : vector<16x1xi32>
    %c16_i32 = arith.constant 16 : i32
    %25 = vector.broadcast %c16_i32 : i32 to vector<16x1xi32>
    %26 = arith.addi %24, %25 : vector<16x1xi32>
    %27 = vector.broadcast %26 : vector<16x1xi32> to vector<16x50xi32>
    %28 = arith.cmpi eq, %8, %27 : vector<16x50xi32>
    %29 = arith.extui %28 : vector<16x50xi1> to vector<16x50xi32>
    %30 = arith.sitofp %29 : vector<16x50xi32> to vector<16x50xf32>
    %31 = arith.addf %21, %30 : vector<16x50xf32>
    %cst = arith.constant dense<0.000000e+00> : vector<16x32xf32>
    %32 = tpu.matmul %31, %3, %cst {dimension_numbers = #tpu.dot_dimension_numbers<[1], [0], [0], [1], [0, 0, 1, 1], [], []>} : vector<16x50xf32>, vector<50x32xf32>, vector<16x32xf32> -> vector<16x32xf32>
    %cst_6 = arith.constant dense<0.000000e+00> : vector<16xf32>
    %33 = vector.multi_reduction <add>, %32, %cst_6 [1] : vector<16x32xf32> to vector<16xf32>
    %34 = vector.shape_cast %33 : vector<16xf32> to vector<16x1xf32>
    %cst_7 = arith.constant 3.200000e+01 : f32
    %35 = vector.broadcast %cst_7 : f32 to vector<16x1xf32>
    %36 = arith.divf %34, %35 : vector<16x1xf32>
    %37 = vector.broadcast %36 : vector<16x1xf32> to vector<16x32xf32>
    %38 = arith.subf %32, %37 : vector<16x32xf32>
    %39 = vector.broadcast %36 : vector<16x1xf32> to vector<16x32xf32>
    %40 = arith.subf %32, %39 : vector<16x32xf32>
    %41 = arith.mulf %38, %40 : vector<16x32xf32>
    %cst_8 = arith.constant dense<0.000000e+00> : vector<16xf32>
    %42 = vector.multi_reduction <add>, %41, %cst_8 [1] : vector<16x32xf32> to vector<16xf32>
    %43 = vector.shape_cast %42 : vector<16xf32> to vector<16x1xf32>
    %cst_9 = arith.constant 3.200000e+01 : f32
    %44 = vector.broadcast %cst_9 : f32 to vector<16x1xf32>
    %45 = arith.divf %43, %44 : vector<16x1xf32>
    %46 = vector.broadcast %36 : vector<16x1xf32> to vector<16x32xf32>
    %47 = arith.subf %32, %46 : vector<16x32xf32>
    %cst_10 = arith.constant 9.99999996E-13 : f32
    %48 = vector.broadcast %cst_10 : f32 to vector<16x1xf32>
    %49 = arith.addf %45, %48 : vector<16x1xf32>
    %50 = math.rsqrt %49 : vector<16x1xf32>
    %51 = vector.broadcast %50 : vector<16x1xf32> to vector<16x32xf32>
    %52 = arith.mulf %47, %51 : vector<16x32xf32>
    %53 = vector.broadcast %4 : vector<1x32xf32> to vector<16x32xf32>
    %54 = arith.mulf %52, %53 : vector<16x32xf32>
    %55 = vector.broadcast %5 : vector<1x32xf32> to vector<16x32xf32>
    %56 = arith.addf %54, %55 : vector<16x32xf32>
    %c0_11 = arith.constant 0 : index
    %c0_12 = arith.constant 0 : index
    %c0_13 = arith.constant 0 : index
    %c0_14 = arith.constant 0 : index
    %57 = vector.load %arg2[%c0_11, %c0_12, %c0_13, %c0_14] : memref<3x4x64x96xbf16, #tpu.memory_space<vmem>>, vector<1x4x64x96xbf16>
    %58 = vector.shape_cast %57 : vector<1x4x64x96xbf16> to vector<4x64x96xbf16>
    %c0_15 = arith.constant 0 : index
    %c0_16 = arith.constant 0 : index
    %c0_17 = arith.constant 0 : index
    %59 = vector.load %arg3[%c0_15, %c0_16, %c0_17] : memref<2x8x96xf32, #tpu.memory_space<vmem>>, vector<1x8x96xf32>
    %60 = vector.shape_cast %59 : vector<1x8x96xf32> to vector<8x96xf32>
    %61 = vector.extract_strided_slice %58 {offsets = [0, 0, 0], sizes = [1, 32, 96], strides = [1, 1, 1]} : vector<4x64x96xbf16> to vector<1x32x96xbf16>
    %62 = vector.shape_cast %61 : vector<1x32x96xbf16> to vector<32x96xbf16>
    %63 = vector.extract_strided_slice %58 {offsets = [1, 0, 0], sizes = [1, 32, 32], strides = [1, 1, 1]} : vector<4x64x96xbf16> to vector<1x32x32xbf16>
    %64 = vector.shape_cast %63 : vector<1x32x32xbf16> to vector<32x32xbf16>
    %65 = vector.extract_strided_slice %58 {offsets = [2, 0, 0], sizes = [1, 32, 64], strides = [1, 1, 1]} : vector<4x64x96xbf16> to vector<1x32x64xbf16>
    %66 = vector.shape_cast %65 : vector<1x32x64xbf16> to vector<32x64xbf16>
    %67 = vector.extract_strided_slice %58 {offsets = [3, 0, 0], sizes = [1, 64, 32], strides = [1, 1, 1]} : vector<4x64x96xbf16> to vector<1x64x32xbf16>
    %68 = vector.shape_cast %67 : vector<1x64x32xbf16> to vector<64x32xbf16>
    %69 = vector.extract_strided_slice %60 {offsets = [0, 0], sizes = [1, 96], strides = [1, 1]} : vector<8x96xf32> to vector<1x96xf32>
    %70 = vector.extract_strided_slice %60 {offsets = [1, 0], sizes = [1, 32], strides = [1, 1]} : vector<8x96xf32> to vector<1x32xf32>
    %71 = vector.extract_strided_slice %60 {offsets = [2, 0], sizes = [1, 32], strides = [1, 1]} : vector<8x96xf32> to vector<1x32xf32>
    %72 = vector.extract_strided_slice %60 {offsets = [3, 0], sizes = [1, 32], strides = [1, 1]} : vector<8x96xf32> to vector<1x32xf32>
    %73 = vector.extract_strided_slice %60 {offsets = [4, 0], sizes = [1, 64], strides = [1, 1]} : vector<8x96xf32> to vector<1x64xf32>
    %74 = vector.extract_strided_slice %60 {offsets = [5, 0], sizes = [1, 32], strides = [1, 1]} : vector<8x96xf32> to vector<1x32xf32>
    %75 = vector.extract_strided_slice %60 {offsets = [6, 0], sizes = [1, 32], strides = [1, 1]} : vector<8x96xf32> to vector<1x32xf32>
    %76 = vector.extract_strided_slice %60 {offsets = [7, 0], sizes = [1, 32], strides = [1, 1]} : vector<8x96xf32> to vector<1x32xf32>
    %77 = arith.truncf %56 : vector<16x32xf32> to vector<16x32xbf16>
    %cst_18 = arith.constant dense<0.000000e+00> : vector<16x96xf32>
    %78 = tpu.matmul %77, %62, %cst_18 {dimension_numbers = #tpu.dot_dimension_numbers<[1], [0], [0], [1], [0, 0, 1, 1], [], []>} : vector<16x32xbf16>, vector<32x96xbf16>, vector<16x96xf32> -> vector<16x96xf32>
    %79 = vector.broadcast %69 : vector<1x96xf32> to vector<16x96xf32>
    %80 = arith.addf %78, %79 : vector<16x96xf32>
    %cst_19 = arith.constant 0.000000e+00 : f32
    %81 = vector.broadcast %cst_19 : f32 to vector<16x32xf32>
    %82 = vector.extract_strided_slice %80 {offsets = [0, 0], sizes = [16, 16], strides = [1, 1]} : vector<16x96xf32> to vector<16x16xf32>
    %83 = vector.extract_strided_slice %80 {offsets = [0, 32], sizes = [16, 16], strides = [1, 1]} : vector<16x96xf32> to vector<16x16xf32>
    %84 = vector.extract_strided_slice %80 {offsets = [0, 64], sizes = [16, 16], strides = [1, 1]} : vector<16x96xf32> to vector<16x16xf32>
    %85 = arith.truncf %82 : vector<16x16xf32> to vector<16x16xbf16>
    %86 = arith.truncf %83 : vector<16x16xf32> to vector<16x16xbf16>
    %cst_20 = arith.constant dense<0.000000e+00> : vector<16x16xf32>
    %87 = tpu.matmul %85, %86, %cst_20 {dimension_numbers = #tpu.dot_dimension_numbers<[1], [1], [0], [0], [0, 0, 1, 0], [], []>} : vector<16x16xbf16>, vector<16x16xbf16>, vector<16x16xf32> -> vector<16x16xf32>
    %cst_21 = arith.constant 2.500000e-01 : f32
    %88 = vector.broadcast %cst_21 : f32 to vector<16x16xf32>
    %89 = arith.mulf %87, %88 : vector<16x16xf32>
    %90 = arith.addf %89, %1 : vector<16x16xf32>
    %cst_22 = arith.constant dense<0xFF800000> : vector<16xf32>
    %91 = vector.multi_reduction <maximumf>, %90, %cst_22 [1] : vector<16x16xf32> to vector<16xf32>
    %92 = vector.shape_cast %91 : vector<16xf32> to vector<16x1xf32>
    %93 = vector.broadcast %92 : vector<16x1xf32> to vector<16x16xf32>
    %94 = arith.subf %90, %93 : vector<16x16xf32>
    %95 = math.exp %94 : vector<16x16xf32>
    %cst_23 = arith.constant dense<0.000000e+00> : vector<16xf32>
    %96 = vector.multi_reduction <add>, %95, %cst_23 [1] : vector<16x16xf32> to vector<16xf32>
    %97 = vector.shape_cast %96 : vector<16xf32> to vector<16x1xf32>
    %98 = tpu.reciprocal %97 {approx = true} : vector<16x1xf32> -> vector<16x1xf32>
    %99 = vector.broadcast %98 : vector<16x1xf32> to vector<16x16xf32>
    %100 = arith.mulf %95, %99 : vector<16x16xf32>
    %101 = arith.truncf %100 : vector<16x16xf32> to vector<16x16xbf16>
    %102 = arith.truncf %84 : vector<16x16xf32> to vector<16x16xbf16>
    %cst_24 = arith.constant dense<0.000000e+00> : vector<16x16xf32>
    %103 = tpu.matmul %101, %102, %cst_24 {dimension_numbers = #tpu.dot_dimension_numbers<[1], [0], [0], [1], [0, 0, 1, 1], [], []>} : vector<16x16xbf16>, vector<16x16xbf16>, vector<16x16xf32> -> vector<16x16xf32>
    %104 = arith.truncf %103 : vector<16x16xf32> to vector<16x16xbf16>
    %105 = vector.extract_strided_slice %64 {offsets = [0, 0], sizes = [16, 32], strides = [1, 1]} : vector<32x32xbf16> to vector<16x32xbf16>
    %cst_25 = arith.constant dense<0.000000e+00> : vector<16x32xf32>
    %106 = tpu.matmul %104, %105, %cst_25 {dimension_numbers = #tpu.dot_dimension_numbers<[1], [0], [0], [1], [0, 0, 1, 1], [], []>} : vector<16x16xbf16>, vector<16x32xbf16>, vector<16x32xf32> -> vector<16x32xf32>
    %107 = arith.addf %81, %106 : vector<16x32xf32>
    %108 = vector.extract_strided_slice %80 {offsets = [0, 16], sizes = [16, 16], strides = [1, 1]} : vector<16x96xf32> to vector<16x16xf32>
    %109 = vector.extract_strided_slice %80 {offsets = [0, 48], sizes = [16, 16], strides = [1, 1]} : vector<16x96xf32> to vector<16x16xf32>
    %110 = vector.extract_strided_slice %80 {offsets = [0, 80], sizes = [16, 16], strides = [1, 1]} : vector<16x96xf32> to vector<16x16xf32>
    %111 = arith.truncf %108 : vector<16x16xf32> to vector<16x16xbf16>
    %112 = arith.truncf %109 : vector<16x16xf32> to vector<16x16xbf16>
    %cst_26 = arith.constant dense<0.000000e+00> : vector<16x16xf32>
    %113 = tpu.matmul %111, %112, %cst_26 {dimension_numbers = #tpu.dot_dimension_numbers<[1], [1], [0], [0], [0, 0, 1, 0], [], []>} : vector<16x16xbf16>, vector<16x16xbf16>, vector<16x16xf32> -> vector<16x16xf32>
    %cst_27 = arith.constant 2.500000e-01 : f32
    %114 = vector.broadcast %cst_27 : f32 to vector<16x16xf32>
    %115 = arith.mulf %113, %114 : vector<16x16xf32>
    %116 = arith.addf %115, %1 : vector<16x16xf32>
    %cst_28 = arith.constant dense<0xFF800000> : vector<16xf32>
    %117 = vector.multi_reduction <maximumf>, %116, %cst_28 [1] : vector<16x16xf32> to vector<16xf32>
    %118 = vector.shape_cast %117 : vector<16xf32> to vector<16x1xf32>
    %119 = vector.broadcast %118 : vector<16x1xf32> to vector<16x16xf32>
    %120 = arith.subf %116, %119 : vector<16x16xf32>
    %121 = math.exp %120 : vector<16x16xf32>
    %cst_29 = arith.constant dense<0.000000e+00> : vector<16xf32>
    %122 = vector.multi_reduction <add>, %121, %cst_29 [1] : vector<16x16xf32> to vector<16xf32>
    %123 = vector.shape_cast %122 : vector<16xf32> to vector<16x1xf32>
    %124 = tpu.reciprocal %123 {approx = true} : vector<16x1xf32> -> vector<16x1xf32>
    %125 = vector.broadcast %124 : vector<16x1xf32> to vector<16x16xf32>
    %126 = arith.mulf %121, %125 : vector<16x16xf32>
    %127 = arith.truncf %126 : vector<16x16xf32> to vector<16x16xbf16>
    %128 = arith.truncf %110 : vector<16x16xf32> to vector<16x16xbf16>
    %cst_30 = arith.constant dense<0.000000e+00> : vector<16x16xf32>
    %129 = tpu.matmul %127, %128, %cst_30 {dimension_numbers = #tpu.dot_dimension_numbers<[1], [0], [0], [1], [0, 0, 1, 1], [], []>} : vector<16x16xbf16>, vector<16x16xbf16>, vector<16x16xf32> -> vector<16x16xf32>
    %130 = arith.truncf %129 : vector<16x16xf32> to vector<16x16xbf16>
    %131 = vector.extract_strided_slice %64 {offsets = [16, 0], sizes = [16, 32], strides = [1, 1]} : vector<32x32xbf16> to vector<16x32xbf16>
    %cst_31 = arith.constant dense<0.000000e+00> : vector<16x32xf32>
    %132 = tpu.matmul %130, %131, %cst_31 {dimension_numbers = #tpu.dot_dimension_numbers<[1], [0], [0], [1], [0, 0, 1, 1], [], []>} : vector<16x16xbf16>, vector<16x32xbf16>, vector<16x32xf32> -> vector<16x32xf32>
    %133 = arith.addf %107, %132 : vector<16x32xf32>
    %134 = vector.broadcast %70 : vector<1x32xf32> to vector<16x32xf32>
    %135 = arith.addf %133, %134 : vector<16x32xf32>
    %136 = arith.addf %135, %56 : vector<16x32xf32>
    %cst_32 = arith.constant dense<0.000000e+00> : vector<16xf32>
    %137 = vector.multi_reduction <add>, %136, %cst_32 [1] : vector<16x32xf32> to vector<16xf32>
    %138 = vector.shape_cast %137 : vector<16xf32> to vector<16x1xf32>
    %cst_33 = arith.constant 3.200000e+01 : f32
    %139 = vector.broadcast %cst_33 : f32 to vector<16x1xf32>
    %140 = arith.divf %138, %139 : vector<16x1xf32>
    %141 = vector.broadcast %140 : vector<16x1xf32> to vector<16x32xf32>
    %142 = arith.subf %136, %141 : vector<16x32xf32>
    %143 = vector.broadcast %140 : vector<16x1xf32> to vector<16x32xf32>
    %144 = arith.subf %136, %143 : vector<16x32xf32>
    %145 = arith.mulf %142, %144 : vector<16x32xf32>
    %cst_34 = arith.constant dense<0.000000e+00> : vector<16xf32>
    %146 = vector.multi_reduction <add>, %145, %cst_34 [1] : vector<16x32xf32> to vector<16xf32>
    %147 = vector.shape_cast %146 : vector<16xf32> to vector<16x1xf32>
    %cst_35 = arith.constant 3.200000e+01 : f32
    %148 = vector.broadcast %cst_35 : f32 to vector<16x1xf32>
    %149 = arith.divf %147, %148 : vector<16x1xf32>
    %150 = vector.broadcast %140 : vector<16x1xf32> to vector<16x32xf32>
    %151 = arith.subf %136, %150 : vector<16x32xf32>
    %cst_36 = arith.constant 9.99999996E-13 : f32
    %152 = vector.broadcast %cst_36 : f32 to vector<16x1xf32>
    %153 = arith.addf %149, %152 : vector<16x1xf32>
    %154 = math.rsqrt %153 : vector<16x1xf32>
    %155 = vector.broadcast %154 : vector<16x1xf32> to vector<16x32xf32>
    %156 = arith.mulf %151, %155 : vector<16x32xf32>
    %157 = vector.broadcast %71 : vector<1x32xf32> to vector<16x32xf32>
    %158 = arith.mulf %156, %157 : vector<16x32xf32>
    %159 = vector.broadcast %72 : vector<1x32xf32> to vector<16x32xf32>
    %160 = arith.addf %158, %159 : vector<16x32xf32>
    %161 = arith.truncf %160 : vector<16x32xf32> to vector<16x32xbf16>
    %cst_37 = arith.constant dense<0.000000e+00> : vector<16x64xf32>
    %162 = tpu.matmul %161, %66, %cst_37 {dimension_numbers = #tpu.dot_dimension_numbers<[1], [0], [0], [1], [0, 0, 1, 1], [], []>} : vector<16x32xbf16>, vector<32x64xbf16>, vector<16x64xf32> -> vector<16x64xf32>
    %163 = vector.broadcast %73 : vector<1x64xf32> to vector<16x64xf32>
    %164 = arith.addf %162, %163 : vector<16x64xf32>
    %cst_38 = arith.constant 5.000000e-01 : f32
    %165 = vector.broadcast %cst_38 : f32 to vector<16x64xf32>
    %166 = arith.mulf %165, %164 : vector<16x64xf32>
    %cst_39 = arith.constant 4.471500e-02 : f32
    %167 = vector.broadcast %cst_39 : f32 to vector<16x64xf32>
    %168 = arith.mulf %167, %164 : vector<16x64xf32>
    %169 = arith.mulf %168, %164 : vector<16x64xf32>
    %170 = arith.mulf %169, %164 : vector<16x64xf32>
    %171 = arith.addf %164, %170 : vector<16x64xf32>
    %cst_40 = arith.constant 0.797884583 : f32
    %172 = vector.broadcast %cst_40 : f32 to vector<16x64xf32>
    %173 = arith.mulf %172, %171 : vector<16x64xf32>
    %174 = math.tanh %173 : vector<16x64xf32>
    %cst_41 = arith.constant 1.000000e+00 : f32
    %175 = vector.broadcast %cst_41 : f32 to vector<16x64xf32>
    %176 = arith.addf %175, %174 : vector<16x64xf32>
    %177 = arith.mulf %166, %176 : vector<16x64xf32>
    %178 = arith.truncf %177 : vector<16x64xf32> to vector<16x64xbf16>
    %cst_42 = arith.constant dense<0.000000e+00> : vector<16x32xf32>
    %179 = tpu.matmul %178, %68, %cst_42 {dimension_numbers = #tpu.dot_dimension_numbers<[1], [0], [0], [1], [0, 0, 1, 1], [], []>} : vector<16x64xbf16>, vector<64x32xbf16>, vector<16x32xf32> -> vector<16x32xf32>
    %180 = vector.broadcast %74 : vector<1x32xf32> to vector<16x32xf32>
    %181 = arith.addf %179, %180 : vector<16x32xf32>
    %182 = arith.addf %181, %160 : vector<16x32xf32>
    %cst_43 = arith.constant dense<0.000000e+00> : vector<16xf32>
    %183 = vector.multi_reduction <add>, %182, %cst_43 [1] : vector<16x32xf32> to vector<16xf32>
    %184 = vector.shape_cast %183 : vector<16xf32> to vector<16x1xf32>
    %cst_44 = arith.constant 3.200000e+01 : f32
    %185 = vector.broadcast %cst_44 : f32 to vector<16x1xf32>
    %186 = arith.divf %184, %185 : vector<16x1xf32>
    %187 = vector.broadcast %186 : vector<16x1xf32> to vector<16x32xf32>
    %188 = arith.subf %182, %187 : vector<16x32xf32>
    %189 = vector.broadcast %186 : vector<16x1xf32> to vector<16x32xf32>
    %190 = arith.subf %182, %189 : vector<16x32xf32>
    %191 = arith.mulf %188, %190 : vector<16x32xf32>
    %cst_45 = arith.constant dense<0.000000e+00> : vector<16xf32>
    %192 = vector.multi_reduction <add>, %191, %cst_45 [1] : vector<16x32xf32> to vector<16xf32>
    %193 = vector.shape_cast %192 : vector<16xf32> to vector<16x1xf32>
    %cst_46 = arith.constant 3.200000e+01 : f32
    %194 = vector.broadcast %cst_46 : f32 to vector<16x1xf32>
    %195 = arith.divf %193, %194 : vector<16x1xf32>
    %196 = vector.broadcast %186 : vector<16x1xf32> to vector<16x32xf32>
    %197 = arith.subf %182, %196 : vector<16x32xf32>
    %cst_47 = arith.constant 9.99999996E-13 : f32
    %198 = vector.broadcast %cst_47 : f32 to vector<16x1xf32>
    %199 = arith.addf %195, %198 : vector<16x1xf32>
    %200 = math.rsqrt %199 : vector<16x1xf32>
    %201 = vector.broadcast %200 : vector<16x1xf32> to vector<16x32xf32>
    %202 = arith.mulf %197, %201 : vector<16x32xf32>
    %203 = vector.broadcast %75 : vector<1x32xf32> to vector<16x32xf32>
    %204 = arith.mulf %202, %203 : vector<16x32xf32>
    %205 = vector.broadcast %76 : vector<1x32xf32> to vector<16x32xf32>
    %206 = arith.addf %204, %205 : vector<16x32xf32>
    %c1 = arith.constant 1 : index
    %c0_48 = arith.constant 0 : index
    %c0_49 = arith.constant 0 : index
    %c0_50 = arith.constant 0 : index
    %207 = vector.load %arg2[%c1, %c0_48, %c0_49, %c0_50] : memref<3x4x64x96xbf16, #tpu.memory_space<vmem>>, vector<1x4x64x96xbf16>
    %208 = vector.shape_cast %207 : vector<1x4x64x96xbf16> to vector<4x64x96xbf16>
    %c1_51 = arith.constant 1 : index
    %c0_52 = arith.constant 0 : index
    %c0_53 = arith.constant 0 : index
    %209 = vector.load %arg3[%c1_51, %c0_52, %c0_53] : memref<2x8x96xf32, #tpu.memory_space<vmem>>, vector<1x8x96xf32>
    %210 = vector.shape_cast %209 : vector<1x8x96xf32> to vector<8x96xf32>
    %211 = vector.extract_strided_slice %208 {offsets = [0, 0, 0], sizes = [1, 32, 96], strides = [1, 1, 1]} : vector<4x64x96xbf16> to vector<1x32x96xbf16>
    %212 = vector.shape_cast %211 : vector<1x32x96xbf16> to vector<32x96xbf16>
    %213 = vector.extract_strided_slice %208 {offsets = [1, 0, 0], sizes = [1, 32, 32], strides = [1, 1, 1]} : vector<4x64x96xbf16> to vector<1x32x32xbf16>
    %214 = vector.shape_cast %213 : vector<1x32x32xbf16> to vector<32x32xbf16>
    %215 = vector.extract_strided_slice %208 {offsets = [2, 0, 0], sizes = [1, 32, 64], strides = [1, 1, 1]} : vector<4x64x96xbf16> to vector<1x32x64xbf16>
    %216 = vector.shape_cast %215 : vector<1x32x64xbf16> to vector<32x64xbf16>
    %217 = vector.extract_strided_slice %208 {offsets = [3, 0, 0], sizes = [1, 64, 32], strides = [1, 1, 1]} : vector<4x64x96xbf16> to vector<1x64x32xbf16>
    %218 = vector.shape_cast %217 : vector<1x64x32xbf16> to vector<64x32xbf16>
    %219 = vector.extract_strided_slice %210 {offsets = [0, 0], sizes = [1, 96], strides = [1, 1]} : vector<8x96xf32> to vector<1x96xf32>
    %220 = vector.extract_strided_slice %210 {offsets = [1, 0], sizes = [1, 32], strides = [1, 1]} : vector<8x96xf32> to vector<1x32xf32>
    %221 = vector.extract_strided_slice %210 {offsets = [2, 0], sizes = [1, 32], strides = [1, 1]} : vector<8x96xf32> to vector<1x32xf32>
    %222 = vector.extract_strided_slice %210 {offsets = [3, 0], sizes = [1, 32], strides = [1, 1]} : vector<8x96xf32> to vector<1x32xf32>
    %223 = vector.extract_strided_slice %210 {offsets = [4, 0], sizes = [1, 64], strides = [1, 1]} : vector<8x96xf32> to vector<1x64xf32>
    %224 = vector.extract_strided_slice %210 {offsets = [5, 0], sizes = [1, 32], strides = [1, 1]} : vector<8x96xf32> to vector<1x32xf32>
    %225 = vector.extract_strided_slice %210 {offsets = [6, 0], sizes = [1, 32], strides = [1, 1]} : vector<8x96xf32> to vector<1x32xf32>
    %226 = vector.extract_strided_slice %210 {offsets = [7, 0], sizes = [1, 32], strides = [1, 1]} : vector<8x96xf32> to vector<1x32xf32>
    %227 = arith.truncf %206 : vector<16x32xf32> to vector<16x32xbf16>
    %cst_54 = arith.constant dense<0.000000e+00> : vector<16x96xf32>
    %228 = tpu.matmul %227, %212, %cst_54 {dimension_numbers = #tpu.dot_dimension_numbers<[1], [0], [0], [1], [0, 0, 1, 1], [], []>} : vector<16x32xbf16>, vector<32x96xbf16>, vector<16x96xf32> -> vector<16x96xf32>
    %229 = vector.broadcast %219 : vector<1x96xf32> to vector<16x96xf32>
    %230 = arith.addf %228, %229 : vector<16x96xf32>
    %cst_55 = arith.constant 0.000000e+00 : f32
    %231 = vector.broadcast %cst_55 : f32 to vector<16x32xf32>
    %232 = vector.extract_strided_slice %230 {offsets = [0, 0], sizes = [16, 16], strides = [1, 1]} : vector<16x96xf32> to vector<16x16xf32>
    %233 = vector.extract_strided_slice %230 {offsets = [0, 32], sizes = [16, 16], strides = [1, 1]} : vector<16x96xf32> to vector<16x16xf32>
    %234 = vector.extract_strided_slice %230 {offsets = [0, 64], sizes = [16, 16], strides = [1, 1]} : vector<16x96xf32> to vector<16x16xf32>
    %235 = arith.truncf %232 : vector<16x16xf32> to vector<16x16xbf16>
    %236 = arith.truncf %233 : vector<16x16xf32> to vector<16x16xbf16>
    %cst_56 = arith.constant dense<0.000000e+00> : vector<16x16xf32>
    %237 = tpu.matmul %235, %236, %cst_56 {dimension_numbers = #tpu.dot_dimension_numbers<[1], [1], [0], [0], [0, 0, 1, 0], [], []>} : vector<16x16xbf16>, vector<16x16xbf16>, vector<16x16xf32> -> vector<16x16xf32>
    %cst_57 = arith.constant 2.500000e-01 : f32
    %238 = vector.broadcast %cst_57 : f32 to vector<16x16xf32>
    %239 = arith.mulf %237, %238 : vector<16x16xf32>
    %240 = arith.addf %239, %1 : vector<16x16xf32>
    %cst_58 = arith.constant dense<0xFF800000> : vector<16xf32>
    %241 = vector.multi_reduction <maximumf>, %240, %cst_58 [1] : vector<16x16xf32> to vector<16xf32>
    %242 = vector.shape_cast %241 : vector<16xf32> to vector<16x1xf32>
    %243 = vector.broadcast %242 : vector<16x1xf32> to vector<16x16xf32>
    %244 = arith.subf %240, %243 : vector<16x16xf32>
    %245 = math.exp %244 : vector<16x16xf32>
    %cst_59 = arith.constant dense<0.000000e+00> : vector<16xf32>
    %246 = vector.multi_reduction <add>, %245, %cst_59 [1] : vector<16x16xf32> to vector<16xf32>
    %247 = vector.shape_cast %246 : vector<16xf32> to vector<16x1xf32>
    %248 = tpu.reciprocal %247 {approx = true} : vector<16x1xf32> -> vector<16x1xf32>
    %249 = vector.broadcast %248 : vector<16x1xf32> to vector<16x16xf32>
    %250 = arith.mulf %245, %249 : vector<16x16xf32>
    %251 = arith.truncf %250 : vector<16x16xf32> to vector<16x16xbf16>
    %252 = arith.truncf %234 : vector<16x16xf32> to vector<16x16xbf16>
    %cst_60 = arith.constant dense<0.000000e+00> : vector<16x16xf32>
    %253 = tpu.matmul %251, %252, %cst_60 {dimension_numbers = #tpu.dot_dimension_numbers<[1], [0], [0], [1], [0, 0, 1, 1], [], []>} : vector<16x16xbf16>, vector<16x16xbf16>, vector<16x16xf32> -> vector<16x16xf32>
    %254 = arith.truncf %253 : vector<16x16xf32> to vector<16x16xbf16>
    %255 = vector.extract_strided_slice %214 {offsets = [0, 0], sizes = [16, 32], strides = [1, 1]} : vector<32x32xbf16> to vector<16x32xbf16>
    %cst_61 = arith.constant dense<0.000000e+00> : vector<16x32xf32>
    %256 = tpu.matmul %254, %255, %cst_61 {dimension_numbers = #tpu.dot_dimension_numbers<[1], [0], [0], [1], [0, 0, 1, 1], [], []>} : vector<16x16xbf16>, vector<16x32xbf16>, vector<16x32xf32> -> vector<16x32xf32>
    %257 = arith.addf %231, %256 : vector<16x32xf32>
    %258 = vector.extract_strided_slice %230 {offsets = [0, 16], sizes = [16, 16], strides = [1, 1]} : vector<16x96xf32> to vector<16x16xf32>
    %259 = vector.extract_strided_slice %230 {offsets = [0, 48], sizes = [16, 16], strides = [1, 1]} : vector<16x96xf32> to vector<16x16xf32>
    %260 = vector.extract_strided_slice %230 {offsets = [0, 80], sizes = [16, 16], strides = [1, 1]} : vector<16x96xf32> to vector<16x16xf32>
    %261 = arith.truncf %258 : vector<16x16xf32> to vector<16x16xbf16>
    %262 = arith.truncf %259 : vector<16x16xf32> to vector<16x16xbf16>
    %cst_62 = arith.constant dense<0.000000e+00> : vector<16x16xf32>
    %263 = tpu.matmul %261, %262, %cst_62 {dimension_numbers = #tpu.dot_dimension_numbers<[1], [1], [0], [0], [0, 0, 1, 0], [], []>} : vector<16x16xbf16>, vector<16x16xbf16>, vector<16x16xf32> -> vector<16x16xf32>
    %cst_63 = arith.constant 2.500000e-01 : f32
    %264 = vector.broadcast %cst_63 : f32 to vector<16x16xf32>
    %265 = arith.mulf %263, %264 : vector<16x16xf32>
    %266 = arith.addf %265, %1 : vector<16x16xf32>
    %cst_64 = arith.constant dense<0xFF800000> : vector<16xf32>
    %267 = vector.multi_reduction <maximumf>, %266, %cst_64 [1] : vector<16x16xf32> to vector<16xf32>
    %268 = vector.shape_cast %267 : vector<16xf32> to vector<16x1xf32>
    %269 = vector.broadcast %268 : vector<16x1xf32> to vector<16x16xf32>
    %270 = arith.subf %266, %269 : vector<16x16xf32>
    %271 = math.exp %270 : vector<16x16xf32>
    %cst_65 = arith.constant dense<0.000000e+00> : vector<16xf32>
    %272 = vector.multi_reduction <add>, %271, %cst_65 [1] : vector<16x16xf32> to vector<16xf32>
    %273 = vector.shape_cast %272 : vector<16xf32> to vector<16x1xf32>
    %274 = tpu.reciprocal %273 {approx = true} : vector<16x1xf32> -> vector<16x1xf32>
    %275 = vector.broadcast %274 : vector<16x1xf32> to vector<16x16xf32>
    %276 = arith.mulf %271, %275 : vector<16x16xf32>
    %277 = arith.truncf %276 : vector<16x16xf32> to vector<16x16xbf16>
    %278 = arith.truncf %260 : vector<16x16xf32> to vector<16x16xbf16>
    %cst_66 = arith.constant dense<0.000000e+00> : vector<16x16xf32>
    %279 = tpu.matmul %277, %278, %cst_66 {dimension_numbers = #tpu.dot_dimension_numbers<[1], [0], [0], [1], [0, 0, 1, 1], [], []>} : vector<16x16xbf16>, vector<16x16xbf16>, vector<16x16xf32> -> vector<16x16xf32>
    %280 = arith.truncf %279 : vector<16x16xf32> to vector<16x16xbf16>
    %281 = vector.extract_strided_slice %214 {offsets = [16, 0], sizes = [16, 32], strides = [1, 1]} : vector<32x32xbf16> to vector<16x32xbf16>
    %cst_67 = arith.constant dense<0.000000e+00> : vector<16x32xf32>
    %282 = tpu.matmul %280, %281, %cst_67 {dimension_numbers = #tpu.dot_dimension_numbers<[1], [0], [0], [1], [0, 0, 1, 1], [], []>} : vector<16x16xbf16>, vector<16x32xbf16>, vector<16x32xf32> -> vector<16x32xf32>
    %283 = arith.addf %257, %282 : vector<16x32xf32>
    %284 = vector.broadcast %220 : vector<1x32xf32> to vector<16x32xf32>
    %285 = arith.addf %283, %284 : vector<16x32xf32>
    %286 = arith.addf %285, %206 : vector<16x32xf32>
    %cst_68 = arith.constant dense<0.000000e+00> : vector<16xf32>
    %287 = vector.multi_reduction <add>, %286, %cst_68 [1] : vector<16x32xf32> to vector<16xf32>
    %288 = vector.shape_cast %287 : vector<16xf32> to vector<16x1xf32>
    %cst_69 = arith.constant 3.200000e+01 : f32
    %289 = vector.broadcast %cst_69 : f32 to vector<16x1xf32>
    %290 = arith.divf %288, %289 : vector<16x1xf32>
    %291 = vector.broadcast %290 : vector<16x1xf32> to vector<16x32xf32>
    %292 = arith.subf %286, %291 : vector<16x32xf32>
    %293 = vector.broadcast %290 : vector<16x1xf32> to vector<16x32xf32>
    %294 = arith.subf %286, %293 : vector<16x32xf32>
    %295 = arith.mulf %292, %294 : vector<16x32xf32>
    %cst_70 = arith.constant dense<0.000000e+00> : vector<16xf32>
    %296 = vector.multi_reduction <add>, %295, %cst_70 [1] : vector<16x32xf32> to vector<16xf32>
    %297 = vector.shape_cast %296 : vector<16xf32> to vector<16x1xf32>
    %cst_71 = arith.constant 3.200000e+01 : f32
    %298 = vector.broadcast %cst_71 : f32 to vector<16x1xf32>
    %299 = arith.divf %297, %298 : vector<16x1xf32>
    %300 = vector.broadcast %290 : vector<16x1xf32> to vector<16x32xf32>
    %301 = arith.subf %286, %300 : vector<16x32xf32>
    %cst_72 = arith.constant 9.99999996E-13 : f32
    %302 = vector.broadcast %cst_72 : f32 to vector<16x1xf32>
    %303 = arith.addf %299, %302 : vector<16x1xf32>
    %304 = math.rsqrt %303 : vector<16x1xf32>
    %305 = vector.broadcast %304 : vector<16x1xf32> to vector<16x32xf32>
    %306 = arith.mulf %301, %305 : vector<16x32xf32>
    %307 = vector.broadcast %221 : vector<1x32xf32> to vector<16x32xf32>
    %308 = arith.mulf %306, %307 : vector<16x32xf32>
    %309 = vector.broadcast %222 : vector<1x32xf32> to vector<16x32xf32>
    %310 = arith.addf %308, %309 : vector<16x32xf32>
    %311 = arith.truncf %310 : vector<16x32xf32> to vector<16x32xbf16>
    %cst_73 = arith.constant dense<0.000000e+00> : vector<16x64xf32>
    %312 = tpu.matmul %311, %216, %cst_73 {dimension_numbers = #tpu.dot_dimension_numbers<[1], [0], [0], [1], [0, 0, 1, 1], [], []>} : vector<16x32xbf16>, vector<32x64xbf16>, vector<16x64xf32> -> vector<16x64xf32>
    %313 = vector.broadcast %223 : vector<1x64xf32> to vector<16x64xf32>
    %314 = arith.addf %312, %313 : vector<16x64xf32>
    %cst_74 = arith.constant 5.000000e-01 : f32
    %315 = vector.broadcast %cst_74 : f32 to vector<16x64xf32>
    %316 = arith.mulf %315, %314 : vector<16x64xf32>
    %cst_75 = arith.constant 4.471500e-02 : f32
    %317 = vector.broadcast %cst_75 : f32 to vector<16x64xf32>
    %318 = arith.mulf %317, %314 : vector<16x64xf32>
    %319 = arith.mulf %318, %314 : vector<16x64xf32>
    %320 = arith.mulf %319, %314 : vector<16x64xf32>
    %321 = arith.addf %314, %320 : vector<16x64xf32>
    %cst_76 = arith.constant 0.797884583 : f32
    %322 = vector.broadcast %cst_76 : f32 to vector<16x64xf32>
    %323 = arith.mulf %322, %321 : vector<16x64xf32>
    %324 = math.tanh %323 : vector<16x64xf32>
    %cst_77 = arith.constant 1.000000e+00 : f32
    %325 = vector.broadcast %cst_77 : f32 to vector<16x64xf32>
    %326 = arith.addf %325, %324 : vector<16x64xf32>
    %327 = arith.mulf %316, %326 : vector<16x64xf32>
    %328 = arith.truncf %327 : vector<16x64xf32> to vector<16x64xbf16>
    %cst_78 = arith.constant dense<0.000000e+00> : vector<16x32xf32>
    %329 = tpu.matmul %328, %218, %cst_78 {dimension_numbers = #tpu.dot_dimension_numbers<[1], [0], [0], [1], [0, 0, 1, 1], [], []>} : vector<16x64xbf16>, vector<64x32xbf16>, vector<16x32xf32> -> vector<16x32xf32>
    %330 = vector.broadcast %224 : vector<1x32xf32> to vector<16x32xf32>
    %331 = arith.addf %329, %330 : vector<16x32xf32>
    %332 = arith.addf %331, %310 : vector<16x32xf32>
    %cst_79 = arith.constant dense<0.000000e+00> : vector<16xf32>
    %333 = vector.multi_reduction <add>, %332, %cst_79 [1] : vector<16x32xf32> to vector<16xf32>
    %334 = vector.shape_cast %333 : vector<16xf32> to vector<16x1xf32>
    %cst_80 = arith.constant 3.200000e+01 : f32
    %335 = vector.broadcast %cst_80 : f32 to vector<16x1xf32>
    %336 = arith.divf %334, %335 : vector<16x1xf32>
    %337 = vector.broadcast %336 : vector<16x1xf32> to vector<16x32xf32>
    %338 = arith.subf %332, %337 : vector<16x32xf32>
    %339 = vector.broadcast %336 : vector<16x1xf32> to vector<16x32xf32>
    %340 = arith.subf %332, %339 : vector<16x32xf32>
    %341 = arith.mulf %338, %340 : vector<16x32xf32>
    %cst_81 = arith.constant dense<0.000000e+00> : vector<16xf32>
    %342 = vector.multi_reduction <add>, %341, %cst_81 [1] : vector<16x32xf32> to vector<16xf32>
    %343 = vector.shape_cast %342 : vector<16xf32> to vector<16x1xf32>
    %cst_82 = arith.constant 3.200000e+01 : f32
    %344 = vector.broadcast %cst_82 : f32 to vector<16x1xf32>
    %345 = arith.divf %343, %344 : vector<16x1xf32>
    %346 = vector.broadcast %336 : vector<16x1xf32> to vector<16x32xf32>
    %347 = arith.subf %332, %346 : vector<16x32xf32>
    %cst_83 = arith.constant 9.99999996E-13 : f32
    %348 = vector.broadcast %cst_83 : f32 to vector<16x1xf32>
    %349 = arith.addf %345, %348 : vector<16x1xf32>
    %350 = math.rsqrt %349 : vector<16x1xf32>
    %351 = vector.broadcast %350 : vector<16x1xf32> to vector<16x32xf32>
    %352 = arith.mulf %347, %351 : vector<16x32xf32>
    %353 = vector.broadcast %225 : vector<1x32xf32> to vector<16x32xf32>
    %354 = arith.mulf %352, %353 : vector<16x32xf32>
    %355 = vector.broadcast %226 : vector<1x32xf32> to vector<16x32xf32>
    %356 = arith.addf %354, %355 : vector<16x32xf32>
    %357 = tpu.iota {dimensions = array<i32: 1>} : vector<2x16xi32>
    %358 = tpu.iota {dimensions = array<i32: 0>} : vector<2x16xi32>
    %c8_i32 = arith.constant 8 : i32
    %359 = vector.broadcast %c8_i32 : i32 to vector<2x16xi32>
    %360 = arith.muli %359, %358 : vector<2x16xi32>
    %361 = arith.cmpi eq, %357, %360 : vector<2x16xi32>
    %362 = arith.extui %361 : vector<2x16xi1> to vector<2x16xi32>
    %363 = arith.sitofp %362 : vector<2x16xi32> to vector<2x16xf32>
    %cst_84 = arith.constant dense<0.000000e+00> : vector<2x32xf32>
    %364 = tpu.matmul %363, %356, %cst_84 {dimension_numbers = #tpu.dot_dimension_numbers<[1], [0], [0], [1], [0, 0, 1, 1], [], []>} : vector<2x16xf32>, vector<16x32xf32>, vector<2x32xf32> -> vector<2x32xf32>
    %c2 = arith.constant 2 : index
    %c0_85 = arith.constant 0 : index
    %c0_86 = arith.constant 0 : index
    %c0_87 = arith.constant 0 : index
    %365 = vector.load %arg2[%c2, %c0_85, %c0_86, %c0_87] : memref<3x4x64x96xbf16, #tpu.memory_space<vmem>>, vector<1x4x64x96xbf16>
    %366 = vector.shape_cast %365 : vector<1x4x64x96xbf16> to vector<4x64x96xbf16>
    %367 = vector.extract_strided_slice %366 {offsets = [0, 0, 0], sizes = [1, 32, 32], strides = [1, 1, 1]} : vector<4x64x96xbf16> to vector<1x32x32xbf16>
    %368 = vector.shape_cast %367 : vector<1x32x32xbf16> to vector<32x32xbf16>
    %369 = vector.extract_strided_slice %366 {offsets = [0, 0, 32], sizes = [1, 32, 2], strides = [1, 1, 1]} : vector<4x64x96xbf16> to vector<1x32x2xbf16>
    %370 = vector.shape_cast %369 : vector<1x32x2xbf16> to vector<32x2xbf16>
    %371 = arith.truncf %364 : vector<2x32xf32> to vector<2x32xbf16>
    %cst_88 = arith.constant dense<0.000000e+00> : vector<2x32xf32>
    %372 = tpu.matmul %371, %368, %cst_88 {dimension_numbers = #tpu.dot_dimension_numbers<[1], [0], [0], [1], [0, 0, 1, 1], [], []>} : vector<2x32xbf16>, vector<32x32xbf16>, vector<2x32xf32> -> vector<2x32xf32>
    %373 = vector.broadcast %6 : vector<1x32xf32> to vector<2x32xf32>
    %374 = arith.addf %372, %373 : vector<2x32xf32>
    %375 = math.tanh %374 : vector<2x32xf32>
    %376 = arith.truncf %375 : vector<2x32xf32> to vector<2x32xbf16>
    %cst_89 = arith.constant dense<0.000000e+00> : vector<2x2xf32>
    %377 = tpu.matmul %376, %370, %cst_89 {dimension_numbers = #tpu.dot_dimension_numbers<[1], [0], [0], [1], [0, 0, 1, 1], [], []>} : vector<2x32xbf16>, vector<32x2xbf16>, vector<2x2xf32> -> vector<2x2xf32>
    %378 = vector.broadcast %7 : vector<1x2xf32> to vector<2x2xf32>
    %379 = arith.addf %377, %378 : vector<2x2xf32>
    %cst_90 = arith.constant dense<0xFF800000> : vector<2xf32>
    %380 = vector.multi_reduction <maximumf>, %379, %cst_90 [1] : vector<2x2xf32> to vector<2xf32>
    %381 = vector.shape_cast %380 : vector<2xf32> to vector<2x1xf32>
    %382 = vector.broadcast %381 : vector<2x1xf32> to vector<2x2xf32>
    %383 = arith.subf %379, %382 : vector<2x2xf32>
    %384 = math.exp %383 : vector<2x2xf32>
    %cst_91 = arith.constant dense<0.000000e+00> : vector<2xf32>
    %385 = vector.multi_reduction <add>, %384, %cst_91 [1] : vector<2x2xf32> to vector<2xf32>
    %386 = vector.shape_cast %385 : vector<2xf32> to vector<2x1xf32>
    %387 = math.log %386 : vector<2x1xf32>
    %388 = vector.broadcast %387 : vector<2x1xf32> to vector<2x2xf32>
    %389 = arith.subf %383, %388 : vector<2x2xf32>
    %c0_92 = arith.constant 0 : index
    %c0_93 = arith.constant 0 : index
    %390 = vector.load %arg5[%c0_92, %c0_93] : memref<2x2xf32, #tpu.memory_space<vmem>>, vector<2x2xf32>
    tpu.vector_store %arg5[%c0_92, %c0_93], %389 {strides = array<i32>} : memref<2x2xf32, #tpu.memory_space<vmem>>, vector<2x2xf32>,
    return
  }
}

</mosaic_0001>

<bundles_post_ra>
// kernel: eq.9
= control target key start
LH: loop header
LB: loop body
LE: loop exit
PB: predicated region body
PF: predicated region fallthrough
CT: control target
= control target key end

     0   :  { %vm7_vm0 = vcmask 64512   ;;  %vm13_vm1 = vcmask 130112   ;;  %s39_s0 = inlined_call_operand.vmem [shape: s32[2,8], index: 0, kind: input, shape index: {}]   ;;  %s40_s1 = inlined_call_operand.vmem [shape: s32[16], index: 1, kind: output, shape index: {}]  }
   0x1   :  { %v4_v0 = vld [vmem:[%s39_s0] sm:$0x3]  ;;  %s22_s0 = smov 8  }
   0x2   :  { %5 = vst [vmem:[#allocation1] sm:$0x3] %v4_v0 }
   0x9   :  { %v10_v1 = vld [vmem:[#allocation1 + $0x1] sm:$0x1]   ;;  %v6_v2 = vld [vmem:[#allocation1] sm:$0x1]  }
   0xa   :  { %11 = vrot.lane.b32.xlu0 %v10_v1, %s22_s0  ;;  %8 = vst.msk [vmem:[#allocation0] sm:$0x1] %vm7_vm0, %v6_v2  }
  0x7c   :  { %v12_v3 = vpop.permute.xlu0 %11  }
  0x7d   :  { %14 = vst.msk [vmem:[#allocation0] sm:$0x1] %vm13_vm1, %v12_v3  }
  0x84   :  { %v17_v4 = vld [vmem:[#allocation0] sm:$0x1] }
  0x85   :  { %20 = vst [vmem:[%s40_s1] sm:$0x1] %v17_v4 }

// kernel: bert_zeroshot_clf_qa_forward.1
= control target key start
LH: loop header
LB: loop body
LE: loop exit
PB: predicated region body
PF: predicated region fallthrough
CT: control target
= control target key end

     0   :  { %10 = vsyncpa [#allocation3], 0  ;;  %s1754_s0 = inlined_call_operand.vmem [shape: s32[16,3], index: 0, kind: input, shape index: {}]   ;;  %s1755_s1 = inlined_call_operand.vmem [shape: f32[16,16], index: 1, kind: input, shape index: {}]   ;;  %s1756_s2 = inlined_call_operand.hbm [shape: bf16[3,4,64,96], index: 2, kind: input, shape index: {}]   ;;  %s1757_s3 = inlined_call_operand.vmem [shape: f32[2,8,96], index: 3, kind: input, shape index: {}]   ;;  %s1758_s4 = inlined_call_operand.vmem [shape: f32[54,32], index: 4, kind: input, shape index: {}]   ;;  %s1759_s5 = inlined_call_operand.hbm [shape: f32[2,2], index: 5, kind: output, shape index: {}]  }
   0x1   :  { %11 = vsyncpa [#allocation4], 0  ;;  %s20_s20 = sshll.u32 %s1756_s2, 4  ;;  %s1476_s21 = smov [#allocation2]   ;;  %s21_s20 = int_to_ptr.hbm [resolvable:$true] %s20_s20 }
   0x2   :  { %s22_s22 = sshll.u32 %s1476_s21, 4  ;;  %s1477_s23 = smov 64   ;;  %s23_s22 = int_to_ptr.vmem [resolvable:$true] %s22_s22 }
   0x3   :  { %s1478_s24 = smov 4  }
   0x4   :  { %28 = dma.hbm_to_vmem [thread:$0]  %s21_s20, 6144, %s23_s22, [#allocation3], %s1477_s23, %s1477_s23, %s1478_s24  }
   0x5   :  { %1472 = dma.done.wait [#allocation3], 6144  }
   0x6   :  { %1473 = vsyncadd [#allocation3], 4294961152  ;;  %v1479_v0 = vmov 0   ;;  %v1480_v1 = vmov 2   ;;  %v1481_v2 = vmov 1   ;;  %v38_v3 = vld [vmem:[%s1754_s0] sm:$0xff]  ;;  %v49_v16 = vlaneseq }
   0x7   :  { %1348 = vset.pattern.permute.xlu0 %v1479_v0  ;;  %1350 = vset.pattern.permute.xlu1 %v1480_v1  ;;  %v39_v4 = vld [vmem:[%s1754_s0 + $0x8] sm:$0xff]  ;;  %v63_v5 = vadd.s32 32, %v38_v3  ;;  %v1533_v9 = vld [vmem:[%s1758_s4 + $0x30] sm:$0x3f]  ;;  %vm102_vm0 = vcmask 1041408   ;;  %v46_v11 = vld [vmem:[%s1758_s4 + $0x20] sm:$0xff] }
   0x8   :  { %1352 = vset.pattern.permute.xlu2 %v1481_v2  ;;  %52 = vperm.xlu0 %1348, %v38_v3   ;;  %v64_v6 = vadd.s32 32, %v39_v4  ;;  %v47_v10 = vld [vmem:[%s1758_s4 + $0x28] sm:$0xff]  ;;  %v45_v12 = vld [vmem:[%s1758_s4 + $0x18] sm:$0xff]  ;;  %v44_v13 = vld [vmem:[%s1758_s4 + $0x10] sm:$0xff]  ;;  %v1555_v19 = vand.u32 127, %v49_v16  ;;  %v1482_v22 = vmov 0.0  }
   0x9   :  { %v79_v7 = vadd.s32 16, %v63_v5  ;;  %1199 = vmatpush.msk.msra.mxu0 %vm102_vm0, %v1533_v9  ;;  %v43_v14 = vld [vmem:[%s1758_s4 + $0x8] sm:$0xff]  ;;  %v42_v15 = vld [vmem:[%s1758_s4] sm:$0xff]  ;;  %vm95_vm4 = vcmask 408576   ;;  %vm129_vm8 = vcmask 261120   ;;  %v1483_v39 = vmov 32.0  }
   0xa   :  { %69 = vperm.xlu2 %1352, %v64_v6   ;;  %v80_v8 = vadd.s32 16, %v64_v6  ;;  %1355 = vrcp.f32 %v1483_v39  ;;  %v1314_v56 = vld [vmem:[#allocation2 + $0x8] sm:$0xff]  ;;  %v1313_v58 = vld [vmem:[#allocation2] sm:$0xff]  ;;  %s1484_s18 = smov 96   ;;  %s1485_s19 = smov 112   ;;  %vm243_vm0 = vcmask 130048  }
   0xb   :  { %82 = vperm.xlu1 %1350, %v79_v7   ;;  %116 = vmatpush.msra.mxu0 %v47_v10  ;;  %s1487_s25 = smov 48   ;;  %s1183_s0 = sshll.u32 %s1759_s5, 4  ;;  %s1184_s0 = int_to_ptr.hbm [resolvable:$true] %s1183_s0 }
   0xc   :  { %231 = vmatpush.bf16.msra.mxu1 %v1314_v56 }
   0xd   :  { %117 = vmatpush.msra.mxu0 %v46_v11 }
   0xf   :  { %118 = vmatpush.msra.mxu0 %v45_v12 }
  0x10   :  { %1349 = vset.pattern.permute.xlu0 %v1481_v2  ;;  %v1356_v40 = vpop.eup %1355  ;;  %232 = vmatpush.bf16.msra.mxu1 %v1313_v58 }
  0x11   :  { %66 = vperm.xlu0 %1349, %v63_v5   ;;  %119 = vmatpush.msra.mxu0 %v44_v13  ;;  %v137_v41 = vmul.f32 32.0, %v1356_v40  ;;  %vm141_vm9 = vweird.f32 %v1356_v40 }
  0x12   :  { %1353 = vset.pattern.permute.xlu2 %v1480_v1 }
  0x13   :  { %85 = vperm.xlu2 %1353, %v80_v8   ;;  %1351 = vset.pattern.permute.xlu1 %v1479_v0  ;;  %v138_v42 = vsub.f32 1.0, %v137_v41  ;;  %v1613_v41 = vld [vmem:[%s1755_s1 + $0x8] sm:$0xff] }
  0x14   :  { %55 = vperm.xlu1 %1351, %v39_v4   ;;  %120 = vmatpush.msra.mxu0 %v43_v14  ;;  %v181_v14 = vperm.slane %v1533_v9, 2 }
  0x15   :  { %v139_v43 = vmul.f32 %v1356_v40, %v138_v42 }
  0x16   :  { %121 = vmatpush.msra.mxu0 %v42_v15 }
  0x17   :  { %v140_v44 = vadd.f32 %v1356_v40, %v139_v43 }
  0x19   :  { %1354 = vset.pattern.permute.xlu0 %v1480_v1  ;;  %v1571_v45 = vsel %vm141_vm9, %v1356_v40, %v140_v44 }
  0x64   :  { %v70_v18 = vpop.permute.xlu2 %69 }
  0x65   :  { %vm72_vm5 = vcmp.eq.s32.totalorder %v1555_v19, %v70_v18 }
  0x66   :  { %v1196_v31 = vsel %vm72_vm5, 1.0, %v1482_v22 }
  0x6d   :  { %v86_v28 = vpop.permute.xlu2 %85 }
  0x6e   :  { %vm88_vm7 = vcmp.eq.s32.totalorder %v1555_v19, %v86_v28  ;;  %v1591_v28 = vld [vmem:[%s1757_s3] sm:$0xff] }
  0x6f   :  { %v1198_v33 = vsel %vm88_vm7, 1.0, %v1482_v22  ;;  %vm560_vm7 = vcmask 523264  }
  0x7a   :  { %v53_v17 = vpop.permute.xlu0 %52 }
  0x7b   :  { %vm57_vm1 = vcmp.eq.s32.totalorder %v1555_v19, %v53_v17 }
  0x7c   :  { %v1193_v23 = vsel %vm57_vm1, 1.0, %v1482_v22 }
  0x7d   :  { %v83_v20 = vpop.permute.xlu1 %82 }
  0x7e   :  { %vm87_vm2 = vcmp.eq.s32.totalorder %v1555_v19, %v83_v20 }
  0x7f   :  { %v1197_v26 = vsel %vm87_vm2, 1.0, %v1482_v22 }
  0x83   :  { %v67_v21 = vpop.permute.xlu0 %66 }
  0x84   :  { %vm71_vm3 = vcmp.eq.s32.totalorder %v1555_v19, %v67_v21  ;;  %v184_v21 = vperm.slane %v1533_v9, 3 }
  0x85   :  { %v1195_v24 = vsel %vm71_vm3, 1.0, %v1482_v22 }
  0x86   :  { %v77_v25 = vadd.f32 %v1195_v24, %v1193_v23  ;;  %v56_v27 = vpop.permute.xlu1 %55 }
  0x87   :  { %vm58_vm6 = vcmp.eq.s32.totalorder %v1555_v19, %v56_v27 }
  0x88   :  { %v93_v29 = vadd.f32 %v1197_v26, %v77_v25  ;;  %v1194_v30 = vsel %vm58_vm6, 1.0, %v1482_v22 }
  0x89   :  { %v78_v32 = vadd.f32 %v1196_v31, %v1194_v30 }
  0x8a   :  { %1200 = vmatmul.msk.f32.vlgmr.msra.gmra.mxu0 %vm95_vm4, %v93_v29  ;;  %v209_v29 = vperm.slane %v1591_v28, 0 }
  0x8b   :  { %v94_v34 = vadd.f32 %v1198_v33, %v78_v32 }
  0x92   :  { %1201 = vmatmul.msk.f32.gmra.mxu0 %vm95_vm4, %v94_v34 }
 0x107   :  { %v123_v35 = vpop.f32.mrf.mxu0 }
 0x108   :  { %v130_v36 = vsel %vm129_vm8, %v123_v35, 0.0 }
 0x109   :  { %131 = vadd.xlane.f32.xlu1 %v130_v36  ;;  %v1606_v36 = vld [vmem:[%s1755_s1] sm:$0xff]  ;;  %s1486_s1 = smov 80  }
 0x10f   :  { %v126_v37 = vpop.f32.mrf.mxu0 }
 0x110   :  { %v133_v38 = vsel %vm129_vm8, %v126_v37, 0.0 }
 0x111   :  { %134 = vadd.xlane.f32.xlu2 %v133_v38 }
 0x17c   :  { %v132_v46 = vpop.xlane.xlu1 %131 }
 0x17d   :  { %v143_v47 = vmul.f32 %v1571_v45, %v132_v46 }
 0x17f   :  { %v145_v48 = vsub.f32 %v123_v35, %v143_v47 }
 0x181   :  { %v147_v49 = vmul.f32 %v145_v48, %v145_v48 }
 0x183   :  { %v149_v50 = vsel %vm129_vm8, %v147_v49, 0.0 }
 0x184   :  { %v135_v51 = vpop.xlane.xlu2 %134  ;;  %150 = vadd.xlane.f32.xlu0 %v149_v50 }
 0x185   :  { %v144_v52 = vmul.f32 %v1571_v45, %v135_v51 }
 0x187   :  { %v146_v53 = vsub.f32 %v126_v37, %v144_v52 }
 0x189   :  { %v148_v54 = vmul.f32 %v146_v53, %v146_v53 }
 0x18b   :  { %v152_v55 = vsel %vm129_vm8, %v148_v54, 0.0 }
 0x18c   :  { %153 = vadd.xlane.f32.xlu2 %v152_v55 }
 0x1f7   :  { %v151_v57 = vpop.xlane.xlu0 %150 }
 0x1f8   :  { %v155_v59 = vmul.f32 %v151_v57, %v1571_v45 }
 0x1fa   :  { %v157_v60 = vadd.f32 1e-12, %v155_v59 }
 0x1fc   :  { %1357 = vrsqrt.f32 %v157_v60  ;;  %vm165_vm11 = vweird.f32 %v157_v60 }
 0x1ff   :  { %v154_v61 = vpop.xlane.xlu2 %153 }
 0x200   :  { %v156_v62 = vmul.f32 %v154_v61, %v1571_v45 }
 0x202   :  { %v1358_v63 = vpop.eup %1357  ;;  %v158_v0 = vadd.f32 1e-12, %v156_v62 }
 0x203   :  { %v160_v1 = vmul.f32 %v1358_v63, %v157_v60  ;;  %vm166_vm10 = vweird.f32 %v1358_v63 }
 0x204   :  { %1359 = vrsqrt.f32 %v158_v0  ;;  %vm167_vm12 = vmor %vm165_vm11, %vm166_vm10  ;;  %vm175_vm14 = vweird.f32 %v158_v0 }
 0x205   :  { %v161_v2 = vmul.f32 %v1358_v63, %v160_v1 }
 0x207   :  { %v162_v3 = vmul.f32 0.5, %v161_v2 }
 0x209   :  { %v163_v4 = vsub.f32 1.5, %v162_v3  ;;  %v1315_v3 = vld [vmem:[#allocation2 + $0x20] sm:$0xff] }
 0x20a   :  { %v1360_v5 = vpop.eup %1359  ;;  %423 = vmatpush.bf16.msrb.mxu0 %v1315_v3 }
 0x20b   :  { %v164_v6 = vmul.f32 %v1358_v63, %v163_v4  ;;  %v170_v7 = vmul.f32 %v1360_v5, %v158_v0  ;;  %vm176_vm13 = vweird.f32 %v1360_v5 }
 0x20c   :  { %vm177_vm15 = vmor %vm175_vm14, %vm176_vm13 }
 0x20d   :  { %v171_v8 = vmul.f32 %v1360_v5, %v170_v7  ;;  %v168_v10 = vsel %vm167_vm12, %v1358_v63, %v164_v6 }
 0x20e   :  { %v179_v13 = vmul.f32 %v168_v10, %v145_v48 }
 0x20f   :  { %v172_v11 = vmul.f32 0.5, %v171_v8 }
 0x210   :  { %v182_v20 = vmul.f32 %v181_v14, %v179_v13 }
 0x211   :  { %v173_v12 = vsub.f32 1.5, %v172_v11 }
 0x212   :  { %v1581_v24 = vadd.f32 %v184_v21, %v182_v20 }
 0x213   :  { %v174_v15 = vmul.f32 %v1360_v5, %v173_v12 }
 0x215   :  { %v178_v17 = vsel %vm177_vm15, %v1360_v5, %v174_v15 }
 0x216   :  { %v180_v18 = vmul.f32 %v178_v17, %v146_v53 }
 0x218   :  { %v183_v23 = vmul.f32 %v181_v14, %v180_v18 }
 0x21a   :  { %v1583_v25 = vadd.f32 %v184_v21, %v183_v23 }
 0x21c   :  { %v208_v26 = vpack.c.bf16 %v1583_v25, %v1581_v24 }
 0x21e   :  { %1210 = vmatmul.msk.bf16.vlgmr.msra.gmra.mxu1 %vm129_vm8, %v208_v26 }
 0x29b   :  { %v234_v27 = vpop.f32.mrf.mxu1 }
 0x29c   :  { %v235_v9 = vadd.f32 %v234_v27, %v209_v29 }
 0x2a3   :  { %v236_v30 = vpop.f32.mrf.mxu1 }
 0x2a4   :  { %v237_v31 = vadd.f32 %v236_v30, %v209_v29 }
 0x2a6   :  { %v1594_v32 = vpack.c.bf16 %v237_v31, %v235_v9 }
 0x2a8   :  { %241 = vrot.lane.b32.xlu1 %v1594_v32, %s1484_s18 }
 0x2b0   :  { %312 = vrot.lane.b32.xlu1 %v1594_v32, %s1485_s19 }
 0x31a   :  { %v242_v33 = vpop.permute.xlu1 %241 }
 0x31b   :  { %v248_v34 = vsel %vm243_vm0, %v242_v33, 0 }
 0x31c   :  { %257 = vmatpush.bf16.xpose.msra.mxu2 %v248_v34 }
 0x322   :  { %v313_v2 = vpop.permute.xlu1 %312 }
 0x323   :  { %1211 = vmatmul.msk.bf16.vlgmr.msra.gmra.mxu2 %vm243_vm0, %v1594_v32 }
 0x3a6   :  { %v259_v35 = vpop.f32.mrf.mxu2 }
 0x3a7   :  { %v264_v37 = vmul.f32 0.25, %v259_v35 }
 0x3a9   :  { %v266_v38 = vadd.f32 %v264_v37, %v1606_v36 }
 0x3ab   :  { %v268_v39 = vsel %vm243_vm0, %v266_v38, -inf }
 0x3ac   :  { %269 = vmax.xlane.f32.xlu2 %v268_v39 }
 0x3ae   :  { %v261_v40 = vpop.f32.mrf.mxu2 }
 0x3af   :  { %v265_v42 = vmul.f32 0.25, %v261_v40 }
 0x3b1   :  { %v267_v43 = vadd.f32 %v265_v42, %v1613_v41  ;;  %v1316_v42 = vld [vmem:[#allocation2 + $0x28] sm:$0xff] }
 0x3b2   :  { %400 = vmatpush.bf16.msrb.mxu2 %v1316_v42 }
 0x3b3   :  { %v271_v44 = vsel %vm243_vm0, %v267_v43, -inf }
 0x3b4   :  { %272 = vmax.xlane.f32.xlu0 %v271_v44 }
 0x41f   :  { %v270_v46 = vpop.xlane.xlu2 %269 }
 0x420   :  { %v274_v47 = vsub.f32 %v266_v38, %v270_v46 }
 0x422   :  { %v276_v48 = vmul.f32 1.442695, %v274_v47  ;;  %v430_v47 = vperm.slane %v1591_v28, 1 }
 0x424   :  { %1361 = vpow2.f32 %v276_v48 }
 0x427   :  { %v273_v49 = vpop.xlane.xlu0 %272 }
 0x428   :  { %v275_v50 = vsub.f32 %v267_v43, %v273_v49 }
 0x42a   :  { %v1362_v51 = vpop.eup %1361  ;;  %v278_v52 = vmul.f32 1.442695, %v275_v50 }
 0x42b   :  { %v280_v53 = vsel %vm243_vm0, %v1362_v51, 0.0 }
 0x42c   :  { %1363 = vpow2.f32 %v278_v52  ;;  %281 = vadd.xlane.f32.xlu2 %v280_v53 }
 0x432   :  { %v1364_v54 = vpop.eup %1363 }
 0x433   :  { %v283_v55 = vsel %vm243_vm0, %v1364_v54, 0.0 }
 0x434   :  { %284 = vadd.xlane.f32.xlu0 %v283_v55 }
 0x444   :  { %291 = vrot.lane.b32.xlu2 %v1594_v32, %s1477_s23 }
 0x448   :  { %314 = vrot.lane.b32.xlu0 %v1594_v32, %s1486_s1 }
 0x49f   :  { %v282_v56 = vpop.xlane.xlu2 %281 }
 0x4a0   :  { %1365 = vrcp.f32 %v282_v56 }
 0x4a6   :  { %v1366_v59 = vpop.eup %1365 }
 0x4a7   :  { %v292_v57 = vpop.permute.xlu2 %291  ;;  %v285_v58 = vpop.xlane.xlu0 %284  ;;  %v288_v61 = vmul.f32 %v1366_v59, %v1362_v51 }
 0x4a8   :  { %1367 = vrcp.f32 %v285_v58  ;;  %304 = vmatpush.bf16.msra.mxu3 %v292_v57 }
 0x4ae   :  { %v1368_v60 = vpop.eup %1367 }
 0x4af   :  { %v289_v62 = vmul.f32 %v1368_v60, %v1364_v54 }
 0x4b1   :  { %v290_v63 = vpack.c.bf16 %v289_v62, %v288_v61 }
 0x4b3   :  { %1212 = vmatmul.msk.bf16.vlgmr.msra.gmra.mxu3 %vm243_vm0, %v290_v63 }
 0x4ba   :  { %v315_v0 = vpop.permute.xlu0 %314 }
 0x4bb   :  { %v320_v1 = vsel %vm243_vm0, %v315_v0, 0 }
 0x4bc   :  { %329 = vmatpush.bf16.xpose.msrb.mxu3 %v320_v1 }
 0x4c3   :  { %1213 = vmatmul.msk.bf16.vlgmr.msrb.gmra.mxu3 %vm243_vm0, %v313_v2 }
 0x536   :  { %v306_v4 = vpop.f32.mrf.mxu3 }
 0x53e   :  { %v308_v5 = vpop.f32.mrf.mxu3 }
 0x53f   :  { %v311_v6 = vpack.c.bf16 %v308_v5, %v306_v4 }
 0x541   :  { %1224 = vmatmul.msk.bf16.vlgmr.msrb.gmra.mxu0 %vm243_vm0, %v311_v6  ;;  %v1317_v6 = vld [vmem:[#allocation2 + $0x40] sm:$0xff] }
 0x546   :  { %v331_v7 = vpop.f32.mrf.mxu3 }
 0x547   :  { %v336_v8 = vmul.f32 0.25, %v331_v7 }
 0x549   :  { %v338_v10 = vadd.f32 %v336_v8, %v1606_v36 }
 0x54b   :  { %v340_v11 = vsel %vm243_vm0, %v338_v10, -inf }
 0x54c   :  { %341 = vmax.xlane.f32.xlu1 %v340_v11 }
 0x54e   :  { %v333_v12 = vpop.f32.mrf.mxu3 }
 0x54f   :  { %v337_v13 = vmul.f32 0.25, %v333_v12 }
 0x551   :  { %v339_v14 = vadd.f32 %v337_v13, %v1613_v41 }
 0x553   :  { %v343_v15 = vsel %vm243_vm0, %v339_v14, -inf }
 0x554   :  { %344 = vmax.xlane.f32.xlu0 %v343_v15 }
 0x5bf   :  { %v342_v17 = vpop.xlane.xlu1 %341 }
 0x5c0   :  { %v346_v18 = vsub.f32 %v338_v10, %v342_v17 }
 0x5c2   :  { %v348_v20 = vmul.f32 1.442695, %v346_v18 }
 0x5c4   :  { %1369 = vpow2.f32 %v348_v20 }
 0x5c7   :  { %v345_v21 = vpop.xlane.xlu0 %344 }
 0x5c8   :  { %v347_v23 = vsub.f32 %v339_v14, %v345_v21 }
 0x5ca   :  { %v1370_v26 = vpop.eup %1369  ;;  %v350_v27 = vmul.f32 1.442695, %v347_v23 }
 0x5cb   :  { %v352_v29 = vsel %vm243_vm0, %v1370_v26, 0.0 }
 0x5cc   :  { %1371 = vpow2.f32 %v350_v27  ;;  %353 = vadd.xlane.f32.xlu2 %v352_v29 }
 0x5d2   :  { %v1372_v30 = vpop.eup %1371 }
 0x5d3   :  { %v355_v9 = vsel %vm243_vm0, %v1372_v30, 0.0 }
 0x5d4   :  { %356 = vadd.xlane.f32.xlu1 %v355_v9 }
 0x5ed   :  { %363 = vrot.lane.b32.xlu1 %v1594_v32, %s1487_s25  ;;  %v425_v32 = vpop.f32.mrf.mxu0 }
 0x5f5   :  { %v427_v53 = vpop.f32.mrf.mxu0 }
 0x63f   :  { %v354_v33 = vpop.xlane.xlu2 %353 }
 0x647   :  { %v357_v31 = vpop.xlane.xlu1 %356 }
 0x648   :  { %1373 = vrcp.f32 %v357_v31 }
 0x649   :  { %1375 = vrcp.f32 %v354_v33 }
 0x64e   :  { %v1374_v34 = vpop.eup %1373 }
 0x64f   :  { %v1376_v35 = vpop.eup %1375  ;;  %v361_v37 = vmul.f32 %v1374_v34, %v1372_v30  ;;  %v479_v30 = vperm.slane %v1591_v28, 2  ;;  %v482_v34 = vperm.slane %v1591_v28, 3 }
 0x650   :  { %v360_v38 = vmul.f32 %v1376_v35, %v1370_v26 }
 0x652   :  { %v362_v40 = vpack.c.bf16 %v361_v37, %v360_v38 }
 0x65f   :  { %v364_v39 = vpop.permute.xlu1 %363 }
 0x660   :  { %376 = vmatpush.bf16.msrb.mxu1 %v364_v39 }
 0x663   :  { %1214 = vmatmul.msk.bf16.vlgmr.msrb.gmra.mxu1 %vm243_vm0, %v362_v40 }
 0x6e0   :  { %v378_v43 = vpop.f32.mrf.mxu1 }
 0x6e8   :  { %v380_v44 = vpop.f32.mrf.mxu1 }
 0x6e9   :  { %v383_v46 = vpack.c.bf16 %v380_v44, %v378_v43  ;;  %v1322_v43 = vld [vmem:[#allocation2 + $0x78] sm:$0xff]  ;;  %v1321_v44 = vld [vmem:[#allocation2 + $0x70] sm:$0xff] }
 0x6ea   :  { %568 = vmatpush.bf16.msra.mxu1 %v1322_v43 }
 0x6eb   :  { %1219 = vmatmul.msk.bf16.vlgmr.msrb.gmra.mxu2 %vm243_vm0, %v383_v46  ;;  %v1320_v46 = vld [vmem:[#allocation2 + $0x68] sm:$0xff] }
 0x6ee   :  { %569 = vmatpush.bf16.msra.mxu1 %v1321_v44 }
 0x6f2   :  { %570 = vmatpush.bf16.msra.mxu1 %v1320_v46 }
 0x76e   :  { %v402_v48 = vpop.f32.mrf.mxu2 }
 0x76f   :  { %v426_v49 = vadd.f32 %v425_v32, %v402_v48  ;;  %v1319_v32 = vld [vmem:[#allocation2 + $0x60] sm:$0xff] }
 0x770   :  { %571 = vmatpush.bf16.msra.mxu1 %v1319_v32 }
 0x771   :  { %v431_v50 = vadd.f32 %v430_v47, %v426_v49 }
 0x773   :  { %v433_v51 = vadd.f32 %v431_v50, %v1581_v24 }
 0x775   :  { %v435_v52 = vsel %vm129_vm8, %v433_v51, 0.0 }
 0x776   :  { %436 = vadd.xlane.f32.xlu0 %v435_v52  ;;  %v404_v54 = vpop.f32.mrf.mxu2 }
 0x777   :  { %v428_v55 = vadd.f32 %v427_v53, %v404_v54 }
 0x779   :  { %v432_v56 = vadd.f32 %v430_v47, %v428_v55  ;;  %v486_v47 = vperm.slane %v1591_v28, 4 }
 0x77b   :  { %v434_v57 = vadd.f32 %v432_v56, %v1583_v25  ;;  %v1318_v25 = vld [vmem:[#allocation2 + $0x48] sm:$0xff] }
 0x77c   :  { %508 = vmatpush.bf16.msra.mxu3 %v1318_v25 }
 0x77d   :  { %v438_v58 = vsel %vm129_vm8, %v434_v57, 0.0 }
 0x77e   :  { %439 = vadd.xlane.f32.xlu2 %v438_v58 }
 0x780   :  { %509 = vmatpush.bf16.msra.mxu3 %v1317_v6 }
 0x7e9   :  { %v437_v59 = vpop.xlane.xlu0 %436 }
 0x7ea   :  { %v441_v60 = vmul.f32 %v437_v59, %v1571_v45 }
 0x7ec   :  { %v443_v61 = vsub.f32 %v433_v51, %v441_v60 }
 0x7ee   :  { %v445_v62 = vmul.f32 %v443_v61, %v443_v61 }
 0x7f0   :  { %v447_v63 = vsel %vm129_vm8, %v445_v62, 0.0 }
 0x7f1   :  { %448 = vadd.xlane.f32.xlu0 %v447_v63  ;;  %v440_v24 = vpop.xlane.xlu2 %439 }
 0x7f2   :  { %v442_v0 = vmul.f32 %v440_v24, %v1571_v45 }
 0x7f4   :  { %v444_v1 = vsub.f32 %v434_v57, %v442_v0 }
 0x7f6   :  { %v446_v2 = vmul.f32 %v444_v1, %v444_v1 }
 0x7f8   :  { %v450_v3 = vsel %vm129_vm8, %v446_v2, 0.0 }
 0x7f9   :  { %451 = vadd.xlane.f32.xlu2 %v450_v3 }
 0x864   :  { %v449_v4 = vpop.xlane.xlu0 %448 }
 0x865   :  { %v453_v5 = vmul.f32 %v449_v4, %v1571_v45 }
 0x867   :  { %v455_v7 = vadd.f32 1e-12, %v453_v5  ;;  %v535_v5 = vperm.slane %v1591_v28, 5 }
 0x869   :  { %1377 = vrsqrt.f32 %v455_v7  ;;  %vm463_vm2 = vweird.f32 %v455_v7 }
 0x86c   :  { %v452_v8 = vpop.xlane.xlu2 %451 }
 0x86d   :  { %v454_v10 = vmul.f32 %v452_v8, %v1571_v45 }
 0x86f   :  { %v1378_v11 = vpop.eup %1377  ;;  %v456_v12 = vadd.f32 1e-12, %v454_v10 }
 0x870   :  { %v458_v13 = vmul.f32 %v1378_v11, %v455_v7  ;;  %vm464_vm1 = vweird.f32 %v1378_v11 }
 0x871   :  { %1379 = vrsqrt.f32 %v456_v12  ;;  %vm465_vm3 = vmor %vm463_vm2, %vm464_vm1  ;;  %vm473_vm5 = vweird.f32 %v456_v12 }
 0x872   :  { %v459_v14 = vmul.f32 %v1378_v11, %v458_v13 }
 0x874   :  { %v460_v15 = vmul.f32 0.5, %v459_v14 }
 0x876   :  { %v461_v17 = vsub.f32 1.5, %v460_v15 }
 0x877   :  { %v1380_v18 = vpop.eup %1379 }
 0x878   :  { %v462_v20 = vmul.f32 %v1378_v11, %v461_v17  ;;  %v468_v21 = vmul.f32 %v1380_v18, %v456_v12  ;;  %vm474_vm4 = vweird.f32 %v1380_v18 }
 0x879   :  { %vm475_vm6 = vmor %vm473_vm5, %vm474_vm4 }
 0x87a   :  { %v469_v23 = vmul.f32 %v1380_v18, %v468_v21  ;;  %v466_v26 = vsel %vm465_vm3, %v1378_v11, %v462_v20 }
 0x87b   :  { %v477_v9 = vmul.f32 %v466_v26, %v443_v61 }
 0x87c   :  { %v470_v27 = vmul.f32 0.5, %v469_v23 }
 0x87d   :  { %v480_v35 = vmul.f32 %v479_v30, %v477_v9  ;;  %v1324_v9 = vld [vmem:[#allocation2 + $0x88] sm:$0xff] }
 0x87e   :  { %v471_v29 = vsub.f32 1.5, %v470_v27  ;;  %676 = vmatpush.bf16.msra.mxu2 %v1324_v9 }
 0x87f   :  { %v483_v39 = vadd.f32 %v482_v34, %v480_v35 }
 0x880   :  { %v472_v31 = vmul.f32 %v1380_v18, %v471_v29 }
 0x882   :  { %v476_v33 = vsel %vm475_vm6, %v1380_v18, %v472_v31 }
 0x883   :  { %v478_v37 = vmul.f32 %v476_v33, %v444_v1 }
 0x885   :  { %v481_v38 = vmul.f32 %v479_v30, %v478_v37 }
 0x887   :  { %v484_v40 = vadd.f32 %v482_v34, %v481_v38  ;;  %v1323_v34 = vld [vmem:[#allocation2 + $0x80] sm:$0xff] }
 0x888   :  { %677 = vmatpush.bf16.msra.mxu2 %v1323_v34 }
 0x889   :  { %v485_v42 = vpack.c.bf16 %v484_v40, %v483_v39 }
 0x88b   :  { %1233 = vmatmul.msk.bf16.vlgmr.msra.gmra.mxu3 %vm129_vm8, %v485_v42 }
 0x90e   :  { %v511_v48 = vpop.f32.mrf.mxu3 }
 0x90f   :  { %v512_v49 = vadd.f32 %v511_v48, %v486_v47 }
 0x911   :  { %v518_v50 = vmul.f32 0.044715, %v512_v49  ;;  %v516_v0 = vmul.f32 0.5, %v512_v49 }
 0x913   :  { %v520_v51 = vmul.f32 %v518_v50, %v512_v49 }
 0x915   :  { %v522_v52 = vmul.f32 %v520_v51, %v512_v49 }
 0x916   :  { %v513_v53 = vpop.f32.mrf.mxu3 }
 0x917   :  { %v524_v54 = vadd.f32 %v522_v52, %v512_v49  ;;  %v514_v55 = vadd.f32 %v513_v53, %v486_v47  ;;  %v624_v53 = vperm.slane %v1591_v28, 6 }
 0x919   :  { %v519_v56 = vmul.f32 0.044715, %v514_v55  ;;  %v526_v57 = vmul.f32 0.7978846, %v524_v54  ;;  %v517_v1 = vmul.f32 0.5, %v514_v55 }
 0x91b   :  { %v521_v58 = vmul.f32 %v519_v56, %v514_v55  ;;  %1381 = vtanh.f32 %v526_v57  ;;  %v627_v57 = vperm.slane %v1591_v28, 7 }
 0x91d   :  { %v523_v59 = vmul.f32 %v521_v58, %v514_v55 }
 0x91f   :  { %v525_v60 = vadd.f32 %v523_v59, %v514_v55 }
 0x921   :  { %v527_v61 = vmul.f32 0.7978846, %v525_v60  ;;  %v1382_v62 = vpop.eup %1381 }
 0x922   :  { %v530_v63 = vadd.f32 1.0, %v1382_v62 }
 0x923   :  { %1383 = vtanh.f32 %v527_v61 }
 0x924   :  { %v532_v3 = vmul.f32 %v530_v63, %v516_v0  ;;  %v1674_v0 = vld [vmem:[%s1757_s3 + $0x8] sm:$0xff] }
 0x925   :  { %v654_v28 = vperm.slane %v1674_v0, 0 }
 0x929   :  { %v1384_v24 = vpop.eup %1383 }
 0x92a   :  { %v531_v2 = vadd.f32 1.0, %v1384_v24 }
 0x92c   :  { %v533_v25 = vmul.f32 %v531_v2, %v517_v1 }
 0x92e   :  { %v534_v4 = vpack.c.bf16 %v533_v25, %v532_v3 }
 0x930   :  { %1250 = vmatmul.msk.bf16.vlgmr.msra.gmra.mxu1 %vm560_vm7, %v534_v4 }
 0x9ad   :  { %v573_v6 = vpop.f32.mrf.mxu1 }
 0x9ae   :  { %v574_v7 = vadd.f32 %v573_v6, %v535_v5 }
 0x9b0   :  { %v578_v8 = vadd.f32 %v574_v7, %v483_v39 }
 0x9b2   :  { %v580_v10 = vsel %vm129_vm8, %v578_v8, 0.0 }
 0x9b3   :  { %581 = vadd.xlane.f32.xlu0 %v580_v10 }
 0x9b5   :  { %v575_v11 = vpop.f32.mrf.mxu1 }
 0x9b6   :  { %v576_v12 = vadd.f32 %v575_v11, %v535_v5 }
 0x9b8   :  { %v579_v13 = vadd.f32 %v576_v12, %v484_v40 }
 0x9ba   :  { %v583_v14 = vsel %vm129_vm8, %v579_v13, 0.0 }
 0x9bb   :  { %584 = vadd.xlane.f32.xlu2 %v583_v14 }
 0xa26   :  { %v582_v15 = vpop.xlane.xlu0 %581 }
 0xa27   :  { %v586_v17 = vmul.f32 %v582_v15, %v1571_v45 }
 0xa29   :  { %v588_v18 = vsub.f32 %v578_v8, %v586_v17 }
 0xa2b   :  { %v590_v20 = vmul.f32 %v588_v18, %v588_v18 }
 0xa2d   :  { %v592_v21 = vsel %vm129_vm8, %v590_v20, 0.0 }
 0xa2e   :  { %v585_v23 = vpop.xlane.xlu2 %584  ;;  %593 = vadd.xlane.f32.xlu1 %v592_v21 }
 0xa2f   :  { %v587_v26 = vmul.f32 %v585_v23, %v1571_v45 }
 0xa31   :  { %v589_v27 = vsub.f32 %v579_v13, %v587_v26 }
 0xa33   :  { %v591_v29 = vmul.f32 %v589_v27, %v589_v27 }
 0xa35   :  { %v595_v30 = vsel %vm129_vm8, %v591_v29, 0.0 }
 0xa36   :  { %596 = vadd.xlane.f32.xlu0 %v595_v30 }
 0xaa1   :  { %v594_v31 = vpop.xlane.xlu1 %593 }
 0xaa2   :  { %v598_v33 = vmul.f32 %v594_v31, %v1571_v45 }
 0xaa4   :  { %v600_v35 = vadd.f32 1e-12, %v598_v33 }
 0xaa6   :  { %1385 = vrsqrt.f32 %v600_v35  ;;  %vm608_vm10 = vweird.f32 %v600_v35 }
 0xaa9   :  { %v597_v37 = vpop.xlane.xlu0 %596 }
 0xaaa   :  { %v599_v38 = vmul.f32 %v597_v37, %v1571_v45 }
 0xaac   :  { %v1386_v39 = vpop.eup %1385  ;;  %v601_v40 = vadd.f32 1e-12, %v599_v38 }
 0xaad   :  { %v603_v42 = vmul.f32 %v1386_v39, %v600_v35  ;;  %vm609_vm9 = vweird.f32 %v1386_v39 }
 0xaae   :  { %1387 = vrsqrt.f32 %v601_v40  ;;  %vm610_vm11 = vmor %vm608_vm10, %vm609_vm9  ;;  %vm618_vm13 = vweird.f32 %v601_v40 }
 0xaaf   :  { %v604_v43 = vmul.f32 %v1386_v39, %v603_v42 }
 0xab1   :  { %v605_v44 = vmul.f32 0.5, %v604_v43 }
 0xab3   :  { %v606_v46 = vsub.f32 1.5, %v605_v44 }
 0xab4   :  { %v1388_v32 = vpop.eup %1387 }
 0xab5   :  { %v607_v47 = vmul.f32 %v1386_v39, %v606_v46  ;;  %v613_v48 = vmul.f32 %v1388_v32, %v601_v40  ;;  %vm619_vm12 = vweird.f32 %v1388_v32 }
 0xab6   :  { %vm620_vm14 = vmor %vm618_vm13, %vm619_vm12 }
 0xab7   :  { %v614_v49 = vmul.f32 %v1388_v32, %v613_v48  ;;  %v611_v50 = vsel %vm610_vm11, %v1386_v39, %v607_v47 }
 0xab8   :  { %v622_v54 = vmul.f32 %v611_v50, %v588_v18 }
 0xab9   :  { %v615_v51 = vmul.f32 0.5, %v614_v49 }
 0xaba   :  { %v625_v58 = vmul.f32 %v624_v53, %v622_v54 }
 0xabb   :  { %v616_v52 = vsub.f32 1.5, %v615_v51 }
 0xabc   :  { %v1664_v61 = vadd.f32 %v627_v57, %v625_v58 }
 0xabd   :  { %v617_v55 = vmul.f32 %v1388_v32, %v616_v52 }
 0xabf   :  { %v621_v56 = vsel %vm620_vm14, %v1388_v32, %v617_v55 }
 0xac0   :  { %v623_v59 = vmul.f32 %v621_v56, %v589_v27 }
 0xac2   :  { %v626_v60 = vmul.f32 %v624_v53, %v623_v59 }
 0xac4   :  { %v1666_v62 = vadd.f32 %v627_v57, %v626_v60 }
 0xac6   :  { %v653_v63 = vpack.c.bf16 %v1666_v62, %v1664_v61 }
 0xac8   :  { %1260 = vmatmul.msk.bf16.vlgmr.msra.gmra.mxu2 %vm129_vm8, %v653_v63 }
 0xb4b   :  { %v679_v24 = vpop.f32.mrf.mxu2 }
 0xb4c   :  { %v680_v2 = vadd.f32 %v679_v24, %v654_v28 }
 0xb53   :  { %v681_v1 = vpop.f32.mrf.mxu2 }
 0xb54   :  { %v682_v3 = vadd.f32 %v681_v1, %v654_v28 }
 0xb56   :  { %v1677_v25 = vpack.c.bf16 %v682_v3, %v680_v2 }
 0xb58   :  { %758 = vrot.lane.b32.xlu0 %v1677_v25, %s1486_s1  ;;  %686 = vrot.lane.b32.xlu2 %v1677_v25, %s1484_s18 }
 0xb60   :  { %756 = vrot.lane.b32.xlu2 %v1677_v25, %s1485_s19 }
 0xbb2   :  { %v687_v4 = vpop.permute.xlu2 %686 }
 0xbb3   :  { %v692_v5 = vsel %vm243_vm0, %v687_v4, 0  ;;  %v1325_v4 = vld [vmem:[#allocation2 + $0xa0] sm:$0xff] }
 0xbb4   :  { %701 = vmatpush.bf16.xpose.msra.mxu0 %v692_v5 }
 0xbba   :  { %v757_v8 = vpop.permute.xlu2 %756 }
 0xbbb   :  { %1261 = vmatmul.msk.bf16.vlgmr.msra.gmra.mxu0 %vm243_vm0, %v1677_v25 }
 0xbca   :  { %v759_v6 = vpop.permute.xlu0 %758 }
 0xbcb   :  { %v764_v7 = vsel %vm243_vm0, %v759_v6, 0  ;;  %v1326_v6 = vld [vmem:[#allocation2 + $0xa8] sm:$0xff] }
 0xbcc   :  { %773 = vmatpush.bf16.xpose.msrb.mxu1 %v764_v7  ;;  %844 = vmatpush.bf16.msrb.mxu0 %v1326_v6 }
 0xbd3   :  { %1263 = vmatmul.msk.bf16.vlgmr.msrb.gmra.mxu1 %vm243_vm0, %v757_v8 }
 0xc38   :  { %v703_v10 = vpop.f32.mrf.mxu0 }
 0xc39   :  { %v708_v11 = vmul.f32 0.25, %v703_v10 }
 0xc3b   :  { %v710_v12 = vadd.f32 %v708_v11, %v1606_v36 }
 0xc3d   :  { %v712_v13 = vsel %vm243_vm0, %v710_v12, -inf }
 0xc3e   :  { %713 = vmax.xlane.f32.xlu0 %v712_v13 }
 0xc40   :  { %v705_v14 = vpop.f32.mrf.mxu0 }
 0xc41   :  { %v709_v15 = vmul.f32 0.25, %v705_v14  ;;  %v874_v14 = vperm.slane %v1674_v0, 1 }
 0xc43   :  { %v711_v17 = vadd.f32 %v709_v15, %v1613_v41 }
 0xc45   :  { %v715_v18 = vsel %vm243_vm0, %v711_v17, -inf }
 0xc46   :  { %716 = vmax.xlane.f32.xlu2 %v715_v18 }
 0xc50   :  { %v775_v20 = vpop.f32.mrf.mxu1 }
 0xc51   :  { %v780_v21 = vmul.f32 0.25, %v775_v20 }
 0xc53   :  { %v782_v23 = vadd.f32 %v780_v21, %v1606_v36 }
 0xc55   :  { %v784_v26 = vsel %vm243_vm0, %v782_v23, -inf }
 0xc56   :  { %785 = vmax.xlane.f32.xlu1 %v784_v26 }
 0xc58   :  { %v777_v27 = vpop.f32.mrf.mxu1 }
 0xc59   :  { %v781_v29 = vmul.f32 0.25, %v777_v27 }
 0xc5b   :  { %v783_v30 = vadd.f32 %v781_v29, %v1613_v41 }
 0xc5d   :  { %v787_v9 = vsel %vm243_vm0, %v783_v30, -inf }
 0xc5e   :  { %735 = vrot.lane.b32.xlu2 %v1677_v25, %s1477_s23  ;;  %788 = vmax.xlane.f32.xlu1 %v787_v9 }
 0xcb1   :  { %v714_v31 = vpop.xlane.xlu0 %713 }
 0xcb2   :  { %v718_v33 = vsub.f32 %v710_v12, %v714_v31 }
 0xcb4   :  { %v720_v34 = vmul.f32 1.442695, %v718_v33 }
 0xcb6   :  { %1389 = vpow2.f32 %v720_v34 }
 0xcb9   :  { %v717_v35 = vpop.xlane.xlu2 %716 }
 0xcba   :  { %v719_v37 = vsub.f32 %v711_v17, %v717_v35 }
 0xcbc   :  { %v1390_v36 = vpop.eup %1389  ;;  %v722_v38 = vmul.f32 1.442695, %v719_v37 }
 0xcbd   :  { %v724_v39 = vsel %vm243_vm0, %v1390_v36, 0.0 }
 0xcbe   :  { %1391 = vpow2.f32 %v722_v38  ;;  %725 = vadd.xlane.f32.xlu1 %v724_v39 }
 0xcc1   :  { %v736_v40 = vpop.permute.xlu2 %735 }
 0xcc2   :  { %748 = vmatpush.bf16.msrb.mxu3 %v736_v40 }
 0xcc4   :  { %v1392_v41 = vpop.eup %1391 }
 0xcc5   :  { %v727_v42 = vsel %vm243_vm0, %v1392_v41, 0.0 }
 0xcc6   :  { %728 = vadd.xlane.f32.xlu1 %v727_v42  ;;  %867 = vmatpush.bf16.msra.mxu3 %v1325_v4 }
 0xcc9   :  { %v786_v43 = vpop.xlane.xlu1 %785 }
 0xcca   :  { %v790_v44 = vsub.f32 %v782_v23, %v786_v43  ;;  %v1327_v43 = vld [vmem:[#allocation2 + $0xc0] sm:$0xff] }
 0xccc   :  { %v792_v46 = vmul.f32 1.442695, %v790_v44 }
 0xcce   :  { %1393 = vpow2.f32 %v792_v46 }
 0xcd1   :  { %v789_v32 = vpop.xlane.xlu1 %788 }
 0xcd2   :  { %v791_v47 = vsub.f32 %v783_v30, %v789_v32 }
 0xcd4   :  { %v1394_v48 = vpop.eup %1393  ;;  %v794_v49 = vmul.f32 1.442695, %v791_v47 }
 0xcd5   :  { %v796_v50 = vsel %vm243_vm0, %v1394_v48, 0.0 }
 0xcd6   :  { %1395 = vpow2.f32 %v794_v49  ;;  %797 = vadd.xlane.f32.xlu0 %v796_v50 }
 0xcdc   :  { %v1396_v51 = vpop.eup %1395 }
 0xcdd   :  { %v799_v52 = vsel %vm243_vm0, %v1396_v51, 0.0 }
 0xcde   :  { %800 = vadd.xlane.f32.xlu1 %v799_v52 }
 0xcea   :  { %807 = vrot.lane.b32.xlu0 %v1677_v25, %s1487_s25 }
 0xd31   :  { %v726_v53 = vpop.xlane.xlu1 %725 }
 0xd32   :  { %1397 = vrcp.f32 %v726_v53 }
 0xd38   :  { %v1398_v55 = vpop.eup %1397 }
 0xd39   :  { %v729_v54 = vpop.xlane.xlu1 %728  ;;  %v732_v57 = vmul.f32 %v1398_v55, %v1390_v36 }
 0xd3a   :  { %1399 = vrcp.f32 %v729_v54 }
 0xd40   :  { %v1400_v56 = vpop.eup %1399 }
 0xd41   :  { %v733_v58 = vmul.f32 %v1400_v56, %v1392_v41 }
 0xd43   :  { %v734_v59 = vpack.c.bf16 %v733_v58, %v732_v57 }
 0xd45   :  { %1262 = vmatmul.msk.bf16.vlgmr.msrb.gmra.mxu3 %vm243_vm0, %v734_v59 }
 0xd49   :  { %v798_v60 = vpop.xlane.xlu0 %797 }
 0xd51   :  { %v801_v63 = vpop.xlane.xlu1 %800 }
 0xd52   :  { %1401 = vrcp.f32 %v801_v63 }
 0xd53   :  { %1403 = vrcp.f32 %v798_v60  ;;  %v923_v60 = vperm.slane %v1674_v0, 2 }
 0xd58   :  { %v1402_v24 = vpop.eup %1401 }
 0xd59   :  { %v1404_v28 = vpop.eup %1403  ;;  %v805_v1 = vmul.f32 %v1402_v24, %v1396_v51 }
 0xd5a   :  { %v804_v2 = vmul.f32 %v1404_v28, %v1394_v48 }
 0xd5c   :  { %v808_v3 = vpop.permute.xlu0 %807  ;;  %v806_v25 = vpack.c.bf16 %v805_v1, %v804_v2  ;;  %v926_v1 = vperm.slane %v1674_v0, 3 }
 0xd5d   :  { %820 = vmatpush.bf16.msrb.mxu2 %v808_v3 }
 0xd60   :  { %1264 = vmatmul.msk.bf16.vlgmr.msrb.gmra.mxu2 %vm243_vm0, %v806_v25 }
 0xdc8   :  { %v750_v5 = vpop.f32.mrf.mxu3 }
 0xdd0   :  { %v752_v7 = vpop.f32.mrf.mxu3 }
 0xdd1   :  { %v755_v8 = vpack.c.bf16 %v752_v7, %v750_v5  ;;  %v1332_v7 = vld [vmem:[#allocation2 + $0xf8] sm:$0xff] }
 0xdd2   :  { %1011 = vmatpush.bf16.msra.mxu2 %v1332_v7 }
 0xdd3   :  { %1274 = vmatmul.msk.bf16.vlgmr.msra.gmra.mxu3 %vm243_vm0, %v755_v8  ;;  %v1331_v8 = vld [vmem:[#allocation2 + $0xf0] sm:$0xff] }
 0xdd6   :  { %1012 = vmatpush.bf16.msra.mxu2 %v1331_v8 }
 0xde3   :  { %v822_v10 = vpop.f32.mrf.mxu2 }
 0xdeb   :  { %v824_v11 = vpop.f32.mrf.mxu2 }
 0xdec   :  { %v827_v12 = vpack.c.bf16 %v824_v11, %v822_v10  ;;  %v1330_v10 = vld [vmem:[#allocation2 + $0xe8] sm:$0xff]  ;;  %v1329_v11 = vld [vmem:[#allocation2 + $0xe0] sm:$0xff] }
 0xded   :  { %1013 = vmatpush.bf16.msra.mxu2 %v1330_v10 }
 0xdee   :  { %1269 = vmatmul.msk.bf16.vlgmr.msrb.gmra.mxu0 %vm243_vm0, %v827_v12  ;;  %v930_v12 = vperm.slane %v1674_v0, 4 }
 0xdf1   :  { %1014 = vmatpush.bf16.msra.mxu2 %v1329_v11  ;;  %v1067_v11 = vperm.slane %v1674_v0, 6 }
 0xe56   :  { %v869_v13 = vpop.f32.mrf.mxu3 }
 0xe5e   :  { %v871_v23 = vpop.f32.mrf.mxu3 }
 0xe6b   :  { %v846_v15 = vpop.f32.mrf.mxu0 }
 0xe6c   :  { %v870_v17 = vadd.f32 %v869_v13, %v846_v15 }
 0xe6e   :  { %v875_v18 = vadd.f32 %v874_v14, %v870_v17 }
 0xe70   :  { %v877_v20 = vadd.f32 %v875_v18, %v1664_v61 }
 0xe72   :  { %v879_v21 = vsel %vm129_vm8, %v877_v20, 0.0 }
 0xe73   :  { %v848_v26 = vpop.f32.mrf.mxu0  ;;  %880 = vadd.xlane.f32.xlu1 %v879_v21 }
 0xe74   :  { %v872_v27 = vadd.f32 %v871_v23, %v848_v26 }
 0xe76   :  { %v876_v29 = vadd.f32 %v874_v14, %v872_v27 }
 0xe78   :  { %v878_v30 = vadd.f32 %v876_v29, %v1666_v62  ;;  %v1328_v62 = vld [vmem:[#allocation2 + $0xc8] sm:$0xff] }
 0xe79   :  { %952 = vmatpush.bf16.msra.mxu1 %v1328_v62  ;;  %v979_v62 = vperm.slane %v1674_v0, 5 }
 0xe7a   :  { %v882_v9 = vsel %vm129_vm8, %v878_v30, 0.0 }
 0xe7b   :  { %883 = vadd.xlane.f32.xlu1 %v882_v9 }
 0xe7d   :  { %953 = vmatpush.bf16.msra.mxu1 %v1327_v43 }
 0xee6   :  { %v881_v31 = vpop.xlane.xlu1 %880 }
 0xee7   :  { %v885_v33 = vmul.f32 %v881_v31, %v1571_v45 }
 0xee9   :  { %v887_v34 = vsub.f32 %v877_v20, %v885_v33 }
 0xeeb   :  { %v889_v35 = vmul.f32 %v887_v34, %v887_v34 }
 0xeed   :  { %v891_v37 = vsel %vm129_vm8, %v889_v35, 0.0 }
 0xeee   :  { %892 = vadd.xlane.f32.xlu1 %v891_v37  ;;  %v884_v61 = vpop.xlane.xlu1 %883 }
 0xeef   :  { %v886_v36 = vmul.f32 %v884_v61, %v1571_v45 }
 0xef1   :  { %v888_v38 = vsub.f32 %v878_v30, %v886_v36 }
 0xef3   :  { %v890_v39 = vmul.f32 %v888_v38, %v888_v38 }
 0xef5   :  { %v894_v40 = vsel %vm129_vm8, %v890_v39, 0.0 }
 0xef6   :  { %895 = vadd.xlane.f32.xlu0 %v894_v40 }
 0xf61   :  { %v893_v41 = vpop.xlane.xlu1 %892 }
 0xf62   :  { %v897_v42 = vmul.f32 %v893_v41, %v1571_v45 }
 0xf64   :  { %v899_v44 = vadd.f32 1e-12, %v897_v42 }
 0xf66   :  { %1405 = vrsqrt.f32 %v899_v44  ;;  %vm907_vm1 = vweird.f32 %v899_v44 }
 0xf69   :  { %v896_v46 = vpop.xlane.xlu0 %895 }
 0xf6a   :  { %v898_v32 = vmul.f32 %v896_v46, %v1571_v45 }
 0xf6c   :  { %v1406_v47 = vpop.eup %1405  ;;  %v900_v48 = vadd.f32 1e-12, %v898_v32 }
 0xf6d   :  { %v902_v49 = vmul.f32 %v1406_v47, %v899_v44  ;;  %vm908_vm15 = vweird.f32 %v1406_v47 }
 0xf6e   :  { %1407 = vrsqrt.f32 %v900_v48  ;;  %vm909_vm2 = vmor %vm907_vm1, %vm908_vm15  ;;  %vm917_vm4 = vweird.f32 %v900_v48 }
 0xf6f   :  { %v903_v50 = vmul.f32 %v1406_v47, %v902_v49 }
 0xf71   :  { %v904_v51 = vmul.f32 0.5, %v903_v50 }
 0xf73   :  { %v905_v52 = vsub.f32 1.5, %v904_v51 }
 0xf74   :  { %v1408_v53 = vpop.eup %1407 }
 0xf75   :  { %v906_v54 = vmul.f32 %v1406_v47, %v905_v52  ;;  %v912_v55 = vmul.f32 %v1408_v53, %v900_v48  ;;  %vm918_vm3 = vweird.f32 %v1408_v53 }
 0xf76   :  { %vm919_vm5 = vmor %vm917_vm4, %vm918_vm3 }
 0xf77   :  { %v913_v56 = vmul.f32 %v1408_v53, %v912_v55  ;;  %v910_v57 = vsel %vm909_vm2, %v1406_v47, %v906_v54 }
 0xf78   :  { %v921_v63 = vmul.f32 %v910_v57, %v887_v34 }
 0xf79   :  { %v914_v58 = vmul.f32 0.5, %v913_v56 }
 0xf7a   :  { %v924_v2 = vmul.f32 %v923_v60, %v921_v63 }
 0xf7b   :  { %v915_v59 = vsub.f32 1.5, %v914_v58 }
 0xf7c   :  { %v927_v4 = vadd.f32 %v926_v1, %v924_v2 }
 0xf7d   :  { %v916_v24 = vmul.f32 %v1408_v53, %v915_v59 }
 0xf7f   :  { %v920_v28 = vsel %vm919_vm5, %v1408_v53, %v916_v24  ;;  %v1334_v24 = vld [vmem:[#allocation2 + $0x108] sm:$0xff] }
 0xf80   :  { %v922_v3 = vmul.f32 %v920_v28, %v888_v38  ;;  %1130 = vmatpush.bf16.msrb.mxu3 %v1334_v24 }
 0xf82   :  { %v925_v25 = vmul.f32 %v923_v60, %v922_v3 }
 0xf84   :  { %v928_v5 = vadd.f32 %v926_v1, %v925_v25 }
 0xf86   :  { %v929_v6 = vpack.c.bf16 %v928_v5, %v927_v4 }
 0xf88   :  { %1283 = vmatmul.msk.bf16.vlgmr.msra.gmra.mxu1 %vm129_vm8, %v929_v6 }
0x1005   :  { %v955_v13 = vpop.f32.mrf.mxu1 }
0x1006   :  { %v956_v14 = vadd.f32 %v955_v13, %v930_v12 }
0x1008   :  { %v962_v15 = vmul.f32 0.044715, %v956_v14  ;;  %v960_v37 = vmul.f32 0.5, %v956_v14 }
0x100a   :  { %v964_v17 = vmul.f32 %v962_v15, %v956_v14 }
0x100c   :  { %v966_v18 = vmul.f32 %v964_v17, %v956_v14  ;;  %v1074_v17 = vshrl.u32 %v49_v16, 7  ;;  %v1333_v16 = vld [vmem:[#allocation2 + $0x100] sm:$0xff] }
0x100d   :  { %v957_v20 = vpop.f32.mrf.mxu1  ;;  %1131 = vmatpush.bf16.msrb.mxu3 %v1333_v16  ;;  %1140 = vrot.lane.b32.xlu0 %v1333_v16, %s1484_s18 }
0x100e   :  { %v968_v21 = vadd.f32 %v966_v18, %v956_v14  ;;  %v958_v23 = vadd.f32 %v957_v20, %v930_v12 }
0x1010   :  { %v963_v26 = vmul.f32 0.044715, %v958_v23  ;;  %v970_v27 = vmul.f32 0.7978846, %v968_v21  ;;  %v961_v61 = vmul.f32 0.5, %v958_v23 }
0x1012   :  { %v965_v29 = vmul.f32 %v963_v26, %v958_v23  ;;  %1409 = vtanh.f32 %v970_v27  ;;  %v1075_v26 = vmul.u32 8, %v1074_v17 }
0x1014   :  { %v967_v30 = vmul.f32 %v965_v29, %v958_v23  ;;  %vm1076_vm13 = vcmp.eq.s32.totalorder %v1555_v19, %v1075_v26  ;;  %v1423_v19 = vld [vmem:[%s1758_s4 + $0x30] sm:$0x3f]  ;;  %s1488_s4 = smov [#allocation5]  }
0x1015   :  { %s1181_s27 = sshll.u32 %s1488_s4, 4  ;;  %s1182_s27 = int_to_ptr.vmem [resolvable:$true] %s1181_s27 }
0x1016   :  { %v969_v9 = vadd.f32 %v967_v30, %v958_v23 }
0x1018   :  { %v971_v31 = vmul.f32 0.7978846, %v969_v9  ;;  %v1410_v33 = vpop.eup %1409 }
0x1019   :  { %v974_v34 = vadd.f32 1.0, %v1410_v33 }
0x101a   :  { %1411 = vtanh.f32 %v971_v31 }
0x101b   :  { %v976_v38 = vmul.f32 %v974_v34, %v960_v37 }
0x1020   :  { %v1412_v35 = vpop.eup %1411 }
0x1021   :  { %v975_v36 = vadd.f32 1.0, %v1412_v35 }
0x1023   :  { %v977_v39 = vmul.f32 %v975_v36, %v961_v61 }
0x1025   :  { %v978_v40 = vpack.c.bf16 %v977_v39, %v976_v38 }
0x1027   :  { %1300 = vmatmul.msk.bf16.vlgmr.msra.gmra.mxu2 %vm560_vm7, %v978_v40  ;;  %v1139_v40 = vperm.slane %v1423_v19, 5 }
0x107f   :  { %v1141_v35 = vpop.permute.xlu0 %1140 }
0x10aa   :  { %v1016_v41 = vpop.f32.mrf.mxu2 }
0x10ab   :  { %v1017_v42 = vadd.f32 %v1016_v41, %v979_v62 }
0x10ad   :  { %v1021_v43 = vadd.f32 %v1017_v42, %v927_v4 }
0x10af   :  { %v1023_v44 = vsel %vm129_vm8, %v1021_v43, 0.0 }
0x10b0   :  { %1024 = vadd.xlane.f32.xlu1 %v1023_v44 }
0x10b2   :  { %v1018_v46 = vpop.f32.mrf.mxu2 }
0x10b3   :  { %v1019_v32 = vadd.f32 %v1018_v46, %v979_v62 }
0x10b5   :  { %v1022_v47 = vadd.f32 %v1019_v32, %v928_v5 }
0x10b7   :  { %v1026_v48 = vsel %vm129_vm8, %v1022_v47, 0.0 }
0x10b8   :  { %1027 = vadd.xlane.f32.xlu2 %v1026_v48 }
0x1123   :  { %v1025_v49 = vpop.xlane.xlu1 %1024 }
0x1124   :  { %v1029_v52 = vmul.f32 %v1025_v49, %v1571_v45 }
0x1126   :  { %v1031_v55 = vsub.f32 %v1021_v43, %v1029_v52 }
0x1128   :  { %v1033_v57 = vmul.f32 %v1031_v55, %v1031_v55 }
0x112a   :  { %v1035_v58 = vsel %vm129_vm8, %v1033_v57, 0.0 }
0x112b   :  { %v1028_v50 = vpop.xlane.xlu2 %1027 }
0x112c   :  { %v1030_v51 = vmul.f32 %v1028_v50, %v1571_v45 }
0x112e   :  { %v1032_v53 = vsub.f32 %v1022_v47, %v1030_v51 }
0x1130   :  { %v1034_v54 = vmul.f32 %v1032_v53, %v1032_v53 }
0x1132   :  { %v1038_v56 = vsel %vm129_vm8, %v1034_v54, 0.0 }
0x1133   :  { %1039 = vadd.xlane.f32.xlu1 %v1038_v56 }
0x113b   :  { %1036 = vadd.xlane.f32.xlu1 %v1035_v58 }
0x1154   :  { %1142 = vrot.lane.b32.xlu1 %v1334_v24, %s1484_s18 }
0x11a6   :  { %v1040_v59 = vpop.xlane.xlu1 %1039 }
0x11a7   :  { %v1042_v60 = vmul.f32 %v1040_v59, %v1571_v45 }
0x11a9   :  { %v1044_v63 = vadd.f32 1e-12, %v1042_v60 }
0x11ab   :  { %1413 = vrsqrt.f32 %v1044_v63  ;;  %vm1061_vm7 = vweird.f32 %v1044_v63 }
0x11ae   :  { %v1037_v28 = vpop.xlane.xlu1 %1036 }
0x11af   :  { %v1041_v1 = vmul.f32 %v1037_v28, %v1571_v45  ;;  %v1070_v45 = vperm.slane %v1674_v0, 7  ;;  %v1301_v0 = vsel %vm1076_vm13, 1.0, %v1482_v22  ;;  %v1108_v22 = vperm.slane %v1423_v19, 4 }
0x11b1   :  { %v1414_v2 = vpop.eup %1413  ;;  %v1043_v3 = vadd.f32 1e-12, %v1041_v1 }
0x11b2   :  { %v1056_v25 = vmul.f32 %v1414_v2, %v1044_v63  ;;  %vm1062_vm6 = vweird.f32 %v1414_v2 }
0x11b3   :  { %1415 = vrsqrt.f32 %v1043_v3  ;;  %vm1063_vm9 = vmor %vm1061_vm7, %vm1062_vm6  ;;  %vm1051_vm11 = vweird.f32 %v1043_v3 }
0x11b4   :  { %v1057_v4 = vmul.f32 %v1414_v2, %v1056_v25 }
0x11b6   :  { %v1058_v5 = vmul.f32 0.5, %v1057_v4 }
0x11b8   :  { %v1059_v6 = vsub.f32 1.5, %v1058_v5 }
0x11b9   :  { %v1416_v7 = vpop.eup %1415 }
0x11ba   :  { %v1060_v8 = vmul.f32 %v1414_v2, %v1059_v6  ;;  %v1046_v10 = vmul.f32 %v1416_v7, %v1043_v3  ;;  %vm1052_vm10 = vweird.f32 %v1416_v7 }
0x11bb   :  { %vm1053_vm12 = vmor %vm1051_vm11, %vm1052_vm10 }
0x11bc   :  { %v1064_v12 = vsel %vm1063_vm9, %v1414_v2, %v1060_v8  ;;  %v1047_v13 = vmul.f32 %v1416_v7, %v1046_v10 }
0x11bd   :  { %v1066_v14 = vmul.f32 %v1064_v12, %v1032_v53 }
0x11be   :  { %v1048_v15 = vmul.f32 0.5, %v1047_v13 }
0x11bf   :  { %v1069_v18 = vmul.f32 %v1067_v11, %v1066_v14 }
0x11c0   :  { %v1049_v20 = vsub.f32 1.5, %v1048_v15 }
0x11c1   :  { %v1072_v21 = vadd.f32 %v1070_v45, %v1069_v18 }
0x11c2   :  { %v1050_v23 = vmul.f32 %v1416_v7, %v1049_v20 }
0x11c3   :  { %1096 = vmatpush.msrb.mxu1 %v1072_v21 }
0x11c4   :  { %v1054_v27 = vsel %vm1053_vm12, %v1416_v7, %v1050_v23 }
0x11c5   :  { %v1065_v29 = vmul.f32 %v1054_v27, %v1031_v55 }
0x11c6   :  { %v1143_v34 = vpop.permute.xlu1 %1142 }
0x11c7   :  { %v1068_v30 = vmul.f32 %v1067_v11, %v1065_v29  ;;  %1155 = vmatpush.bf16.msra.mxu0 %v1143_v34 }
0x11c9   :  { %v1071_v9 = vadd.f32 %v1070_v45, %v1068_v30 }
0x11cb   :  { %1097 = vmatpush.msrb.mxu1 %v1071_v9  ;;  %1156 = vmatpush.bf16.msra.mxu0 %v1141_v35 }
0x11cc   :  { %1302 = vmatmul.msk.f32.vlgmr.msrb.gmra.mxu1 %vm243_vm0, %v1301_v0  ;;  %vm1162_vm0 = vcmask 9216  }
0x1249   :  { %v1099_v31 = vpop.f32.mrf.mxu1 }
0x124a   :  { %v1107_v33 = vpack.c.bf16 %v1099_v31, %v1099_v31 }
0x124c   :  { %1311 = vmatmul.msk.bf16.vlgmr.msrb.gmra.mxu3 %vm129_vm8, %v1107_v33 }
0x12cf   :  { %v1133_v37 = vpop.f32.mrf.mxu3 }
0x12d0   :  { %v1134_v61 = vadd.f32 %v1133_v37, %v1108_v22 }
0x12d2   :  { %1417 = vtanh.f32 %v1134_v61 }
0x12d7   :  { %v1135_v36 = vpop.f32.mrf.mxu3 }
0x12d8   :  { %v1418_v38 = vpop.eup %1417 }
0x12d9   :  { %v1138_v39 = vpack.c.bf16 %v1418_v38, %v1418_v38 }
0x12db   :  { %1312 = vmatmul.msk.bf16.vlgmr.msra.gmra.mxu0 %vm129_vm8, %v1138_v39 }
0x1358   :  { %v1158_v62 = vpop.f32.mrf.mxu0 }
0x1359   :  { %v1159_v41 = vadd.f32 %v1158_v62, %v1139_v40 }
0x135b   :  { %v1163_v42 = vsel %vm1162_vm0, %v1159_v41, -inf }
0x135c   :  { %1164 = vmax.xlane.f32.xlu2 %v1163_v42 }
0x1360   :  { %v1160_v43 = vpop.f32.mrf.mxu0 }
0x13cf   :  { %v1165_v44 = vpop.xlane.xlu2 %1164 }
0x13d0   :  { %v1166_v46 = vsub.f32 %v1159_v41, %v1165_v44 }
0x13d2   :  { %v1167_v32 = vmul.f32 1.442695, %v1166_v46 }
0x13d4   :  { %1419 = vpow2.f32 %v1167_v32 }
0x13da   :  { %v1420_v47 = vpop.eup %1419 }
0x13db   :  { %v1169_v48 = vsel %vm1162_vm0, %v1420_v47, 0.0 }
0x13dc   :  { %1170 = vadd.xlane.f32.xlu2 %v1169_v48 }
0x144f   :  { %v1171_v49 = vpop.xlane.xlu2 %1170 }
0x1450   :  { %1421 = vlog2.f32 %v1171_v49 }
0x1456   :  { %v1422_v50 = vpop.eup %1421 }
0x1457   :  { %v1173_v51 = vmul.f32 0.6931472, %v1422_v50 }
0x1459   :  { %v1174_v52 = vsub.f32 %v1166_v46, %v1173_v51 }
0x145b   :  { %1175 = vst.msk [vmem:[#allocation5] sm:$0x3] %vm1162_vm0, %v1174_v52 }
0x145c   :  { %1186 = dma.vmem_to_hbm [thread:$0]  %s1182_s27, 32, %s1184_s0, [#allocation4]  }
0x145d   :  { %1474 = dma.done.wait [#allocation4], 32  }
0x145e   :  { %1475 = vsyncadd [#allocation4], 4294967264 }
0x145f   :  { %1191 = vsyncpa [#allocation3], 1 }
0x1460   :  { %1192 = vsyncpa [#allocation4], 1 }

</bundles_post_ra>
